<compile_context>
chip_gen: v5e
topology: v5e:2x2
jax: 0.10.0
libtpu: 0.0.40
codegen_flags: <defaults>
</compile_context>

<pallas_src>
import functools

import jax
import jax.numpy as jnp
from jax.experimental import pallas as pl
from jax.experimental.pallas import tpu as pltpu


def _round_up(v, m):
    return (v + m - 1) // m * m


def _omoe_kernel(x_ref, w1_ref, b1_ref, w2_ref, b2_ref, wg2_ref, bg2_ref,
                 out_ref, *, num_experts, h1p, h2p, g1p):
    """One batch tile of the OMoE layer (all weights VMEM-resident).

    x_ref   : [BT, D]            bf16
    w1_ref  : [D, E*H1P + G1P]   bf16  fused layer-1 (expert stack ++ gate hidden)
    b1_ref  : [1, E*H1P + G1P]   f32
    w2_ref  : [E, H1P, H2P]      bf16  per-expert layer-2 weights (zero padded)
    b2_ref  : [1, E*H2P]         f32
    wg2_ref : [G1P, 128]         bf16  gate output layer (E real cols, rest 0)
    bg2_ref : [1, 128]           f32   (-1e30 in padded cols -> exp == 0)
    out_ref : [BT, H2P]          f32   lane-dense (wrapper slices back to H2)
    """
    eh1p = num_experts * h1p

    # ---- fused first layer: all experts + gate hidden in one lane-dense MXU
    # matmul, one bias+ReLU VPU pass, one bf16 cast pass. ----
    h_all = jnp.dot(x_ref[...], w1_ref[...], preferred_element_type=jnp.float32)
    h_all = jnp.maximum(h_all + b1_ref[...], 0.0)            # [BT, E*H1P+G1P] f32
    h_bf = h_all.astype(w2_ref.dtype)                        # single cast pass

    # ---- gate: narrow [BT, 128] logits, softmax over one vreg-width block.
    # Padded columns carry -1e30 bias so exp underflows to exactly 0. ----
    g_h = h_bf[:, eh1p:eh1p + g1p]                           # [BT, G1P], 128-aligned
    logits = jnp.dot(g_h, wg2_ref[...],
                     preferred_element_type=jnp.float32) + bg2_ref[...]
    m = jnp.max(logits, axis=-1, keepdims=True)              # finite (real cols exist)
    z = jnp.exp(logits - m)                                  # padded cols -> 0
    denom = jnp.sum(z, axis=-1, keepdims=True)
    gate = z * pl.reciprocal(denom, approx=True)             # [BT, 128] f32

    # ---- per-expert second layers + gate-weighted accumulation.  Static E
    # unroll; every slice boundary is 128-lane aligned. ----
    acc = None
    for e in range(num_experts):
        h_e = h_bf[:, e * h1p:(e + 1) * h1p]                 # [BT, H1P]
        h2_e = jnp.dot(h_e, w2_ref[e], preferred_element_type=jnp.float32)
        h2_e = jnp.maximum(h2_e + b2_ref[:, e * h2p:(e + 1) * h2p], 0.0)
        term = gate[:, e:e + 1] * h2_e                       # lane-broadcast multiply
        acc = term if acc is None else acc + term
    out_ref[...] = acc.astype(out_ref.dtype)                 # lane-dense store


def prepare_omoe_params(params, dtype=jnp.bfloat16):
    """One-time folding of PyTorch-layout parameters into kernel operands.

    Call once at init (or let the results become jit constants).  Only
    pads / transposes / reshapes -- no per-expert scatter loop.
    """
    we1, be1, we2, be2, wg1, bg1, wg2, bg2 = params
    E, D, H1 = we1.shape
    H2 = we2.shape[-1]
    G1 = wg1.shape[-1]
    f32 = jnp.float32

    H1P = _round_up(H1, 128)
    H2P = _round_up(H2, 128)
    G1P = _round_up(G1, 128)
    EP = _round_up(E, 128)       # gate logit lane width (single vreg block)

    # Fused layer-1 weights [D, E*H1P + G1P]; per-expert blocks zero-padded to
    # H1P so every static slice in the kernel is 128-lane aligned.
    we1p = jnp.pad(we1, ((0, 0), (0, 0), (0, H1P - H1)))
    w1cat = jnp.concatenate(
        [jnp.transpose(we1p, (1, 0, 2)).reshape(D, E * H1P),
         jnp.pad(wg1, ((0, 0), (0, G1P - G1)))], axis=1).astype(dtype)
    b1cat = jnp.concatenate(
        [jnp.pad(be1, ((0, 0), (0, 0), (0, H1P - H1))).reshape(1, E * H1P),
         jnp.pad(bg1, ((0, 0), (0, G1P - G1)))], axis=1).astype(f32)

    # Per-expert layer-2 weights (NOT block-diagonal): [E, H1P, H2P].
    w2p = jnp.pad(we2, ((0, 0), (0, H1P - H1), (0, H2P - H2))).astype(dtype)
    b2cat = jnp.pad(be2, ((0, 0), (0, 0), (0, H2P - H2))
                    ).reshape(1, E * H2P).astype(f32)

    # Narrow gate output layer: E real columns inside one 128-lane block;
    # padded columns get zero weight and -1e30 bias.
    wg2p = jnp.pad(wg2, ((0, G1P - G1), (0, EP - E))).astype(dtype)
    bg2p = jnp.concatenate(
        [bg2.astype(f32), jnp.full((1, EP - E), -1e30, f32)], axis=1)

    dims = dict(num_experts=E, input_dim=D, h1p=H1P, h2=H2, h2p=H2P,
                g1p=G1P, ep=EP)
    return (w1cat, b1cat, w2p, b2cat, wg2p, bg2p), dims


def omoe_forward(x, folded, *, dims, num_tasks, batch_tile=64):
    """Runs the OMoE layer. Returns a list of num_tasks arrays [B, H2]."""
    w1cat, b1cat, w2p, b2cat, wg2p, bg2p = folded
    B, D = x.shape
    E = dims["num_experts"]
    H1P, H2, H2P, G1P, EP = (dims["h1p"], dims["h2"], dims["h2p"],
                             dims["g1p"], dims["ep"])
    assert D == dims["input_dim"]
    assert B % batch_tile == 0
    W1N = E * H1P + G1P
    f32 = jnp.float32

    x_bf = x.astype(w1cat.dtype)

    full = lambda shape: pl.BlockSpec(shape, lambda i: (0,) * len(shape))

    flops = 2 * B * (D * W1N + E * H1P * H2P + G1P * EP)
    bytes_accessed = (x_bf.size * 2
                      + (w1cat.size + w2p.size + wg2p.size) * 2
                      + (b1cat.size + b2cat.size + bg2p.size) * 4
                      + B * H2P * 4)
    cost = pl.CostEstimate(flops=int(flops), transcendentals=int(B * EP),
                           bytes_accessed=int(bytes_accessed))

    kernel = functools.partial(_omoe_kernel, num_experts=E, h1p=H1P, h2p=H2P,
                               g1p=G1P)
    out = pl.pallas_call(
        kernel,
        out_shape=jax.ShapeDtypeStruct((B, H2P), f32),
        grid_spec=pltpu.PrefetchScalarGridSpec(
            num_scalar_prefetch=0,
            grid=(B // batch_tile,),
            in_specs=[
                pl.BlockSpec((batch_tile, D), lambda i: (i, 0)),  # x tile
                full((D, W1N)),          # fused layer-1 weights (VMEM-resident)
                full((1, W1N)),
                full((E, H1P, H2P)),     # per-expert layer-2 weights
                full((1, E * H2P)),
                full((G1P, EP)),         # narrow gate output weights
                full((1, EP)),
            ],
            out_specs=pl.BlockSpec((batch_tile, H2P), lambda i: (i, 0)),
        ),
        compiler_params=pltpu.CompilerParams(
            dimension_semantics=("parallel",),   # batch tiles shard over TCs
            vmem_limit_bytes=32 * 1024 * 1024,   # safe on v5e/v6e/v7x
        ),
        cost_estimate=cost,
    )(x_bf, w1cat, b1cat, w2p, b2cat, wg2p, bg2p)

    out = out[:, :H2]
    # Gate is task-independent -> each task's output is identical.
    return [out for _ in range(num_tasks)]


def _reference(x, params, num_experts, num_tasks):
    we1, be1, we2, be2, wg1, bg1, wg2, bg2 = params
    expert_outs = []
    for i in range(num_experts):
        h1 = jax.nn.relu(x @ we1[i] + be1[i])
        h2 = jax.nn.relu(h1 @ we2[i] + be2[i])
        expert_outs.append(h2)
    experts_output = jnp.stack(expert_outs, axis=1)                 # [B, E, H2]
    gate = jax.nn.softmax(jax.nn.relu(x @ wg1 + bg1) @ wg2 + bg2, axis=-1)
    out = jnp.sum(gate[:, :, None] * experts_output, axis=1)
    return [out for _ in range(num_tasks)]


if __name__ == "__main__":
    # Small, deterministic config (batch sized to give >=2 grid steps per core).
    B, D = 256, 64               # batch, input_dim
    E, T = 4, 2                  # num_experts, num_tasks
    H1, H2 = 64, 64              # expert_hidden_units = [64, 64]
    G1 = 64                      # gate_hidden_units   = [64]

    key = jax.random.PRNGKey(0)
    ks = jax.random.split(key, 9)
    scale = 0.1
    x = jax.random.normal(ks[0], (B, D), jnp.float32)
    params = (
        scale * jax.random.normal(ks[1], (E, D, H1), jnp.float32),   # We1
        scale * jax.random.normal(ks[2], (E, 1, H1), jnp.float32),   # be1
        scale * jax.random.normal(ks[3], (E, H1, H2), jnp.float32),  # We2
        scale * jax.random.normal(ks[4], (E, 1, H2), jnp.float32),   # be2
        scale * jax.random.normal(ks[5], (D, G1), jnp.float32),      # Wg1
        scale * jax.random.normal(ks[6], (1, G1), jnp.float32),      # bg1
        scale * jax.random.normal(ks[7], (G1, E), jnp.float32),      # Wg2
        scale * jax.random.normal(ks[8], (1, E), jnp.float32),       # bg2
    )

    # One-time parameter folding (out of the per-call forward path).
    folded, dims = prepare_omoe_params(params)
    folded = jax.tree_util.tree_map(jax.block_until_ready, folded)

    fwd = jax.jit(functools.partial(omoe_forward, dims=dims, num_tasks=T,
                                    batch_tile=64))
    outs = fwd(x, folded)
    outs = [jax.block_until_ready(o) for o in outs]

    refs = _reference(x, params, E, T)
    for o, r in zip(outs, refs):
        assert o.shape == (B, H2)
        # bf16 matmul operands + approx reciprocal -> ~1e-2 level differences.
        err = float(jnp.max(jnp.abs(o - r)))
        assert jnp.allclose(o, r, atol=3e-2, rtol=3e-2), f"max abs err {err}"

    print("KERNEL_OK")
</pallas_src>

<mosaic_0001>
module attributes {stable_mosaic.version = 11 : i64} {
  func.func @_omoe_kernel(%arg0: i32, %arg1: memref<64x64xbf16, #tpu.memory_space<vmem>>, %arg2: memref<64x640xbf16, #tpu.memory_space<vmem>>, %arg3: memref<1x640xf32, #tpu.memory_space<vmem>>, %arg4: memref<4x128x128xbf16, #tpu.memory_space<vmem>>, %arg5: memref<1x512xf32, #tpu.memory_space<vmem>>, %arg6: memref<128x128xbf16, #tpu.memory_space<vmem>>, %arg7: memref<1x128xf32, #tpu.memory_space<vmem>>, %arg8: memref<64x128xf32, #tpu.memory_space<vmem>>) attributes {dimension_semantics = [#tpu.dimension_semantics<parallel>], iteration_bounds = array<i64: 4>, scalar_prefetch = 0 : i64, scratch_operands = 0 : i64, tpu.core_type = #tpu.core_type<tc>, window_params = [{transform_indices = @transform_0, window_bounds = array<i64: 64, 64>}, {pipeline_mode = #tpu.pipeline_mode<synchronous>, transform_indices = @transform_1, window_bounds = array<i64: 64, 640>}, {pipeline_mode = #tpu.pipeline_mode<synchronous>, transform_indices = @transform_2, window_bounds = array<i64: 1, 640>}, {pipeline_mode = #tpu.pipeline_mode<synchronous>, transform_indices = @transform_3, window_bounds = array<i64: 4, 128, 128>}, {pipeline_mode = #tpu.pipeline_mode<synchronous>, transform_indices = @transform_4, window_bounds = array<i64: 1, 512>}, {pipeline_mode = #tpu.pipeline_mode<synchronous>, transform_indices = @transform_5, window_bounds = array<i64: 128, 128>}, {pipeline_mode = #tpu.pipeline_mode<synchronous>, transform_indices = @transform_6, window_bounds = array<i64: 1, 128>}, {transform_indices = @transform_7, window_bounds = array<i64: 64, 128>}]} {
    %c0 = arith.constant 0 : index
    %c0_0 = arith.constant 0 : index
    %0 = vector.load %arg1[%c0, %c0_0] : memref<64x64xbf16, #tpu.memory_space<vmem>>, vector<64x64xbf16>
    %c0_1 = arith.constant 0 : index
    %c0_2 = arith.constant 0 : index
    %1 = vector.load %arg2[%c0_1, %c0_2] : memref<64x640xbf16, #tpu.memory_space<vmem>>, vector<64x640xbf16>
    %cst = arith.constant dense<0.000000e+00> : vector<64x640xf32>
    %2 = tpu.matmul %0, %1, %cst {dimension_numbers = #tpu.dot_dimension_numbers<[1], [0], [0], [1], [0, 0, 1, 1], [], []>} : vector<64x64xbf16>, vector<64x640xbf16>, vector<64x640xf32> -> vector<64x640xf32>
    %c0_3 = arith.constant 0 : index
    %c0_4 = arith.constant 0 : index
    %3 = vector.load %arg3[%c0_3, %c0_4] : memref<1x640xf32, #tpu.memory_space<vmem>>, vector<1x640xf32>
    %4 = vector.broadcast %3 : vector<1x640xf32> to vector<64x640xf32>
    %5 = arith.addf %2, %4 : vector<64x640xf32>
    %cst_5 = arith.constant 0.000000e+00 : f32
    %6 = vector.broadcast %cst_5 : f32 to vector<64x640xf32>
    %7 = arith.maximumf %5, %6 : vector<64x640xf32>
    %8 = arith.truncf %7 : vector<64x640xf32> to vector<64x640xbf16>
    %9 = vector.extract_strided_slice %8 {offsets = [0, 512], sizes = [64, 128], strides = [1, 1]} : vector<64x640xbf16> to vector<64x128xbf16>
    %c0_6 = arith.constant 0 : index
    %c0_7 = arith.constant 0 : index
    %10 = vector.load %arg6[%c0_6, %c0_7] : memref<128x128xbf16, #tpu.memory_space<vmem>>, vector<128x128xbf16>
    %cst_8 = arith.constant dense<0.000000e+00> : vector<64x128xf32>
    %11 = tpu.matmul %9, %10, %cst_8 {dimension_numbers = #tpu.dot_dimension_numbers<[1], [0], [0], [1], [0, 0, 1, 1], [], []>} : vector<64x128xbf16>, vector<128x128xbf16>, vector<64x128xf32> -> vector<64x128xf32>
    %c0_9 = arith.constant 0 : index
    %c0_10 = arith.constant 0 : index
    %12 = vector.load %arg7[%c0_9, %c0_10] : memref<1x128xf32, #tpu.memory_space<vmem>>, vector<1x128xf32>
    %13 = vector.broadcast %12 : vector<1x128xf32> to vector<64x128xf32>
    %14 = arith.addf %11, %13 : vector<64x128xf32>
    %cst_11 = arith.constant dense<0xFF800000> : vector<64xf32>
    %15 = vector.multi_reduction <maximumf>, %14, %cst_11 [1] : vector<64x128xf32> to vector<64xf32>
    %16 = vector.shape_cast %15 : vector<64xf32> to vector<64x1xf32>
    %17 = vector.broadcast %16 : vector<64x1xf32> to vector<64x128xf32>
    %18 = arith.subf %14, %17 : vector<64x128xf32>
    %19 = math.exp %18 : vector<64x128xf32>
    %cst_12 = arith.constant dense<0.000000e+00> : vector<64xf32>
    %20 = vector.multi_reduction <add>, %19, %cst_12 [1] : vector<64x128xf32> to vector<64xf32>
    %21 = vector.shape_cast %20 : vector<64xf32> to vector<64x1xf32>
    %22 = tpu.reciprocal %21 {approx = true} : vector<64x1xf32> -> vector<64x1xf32>
    %23 = vector.broadcast %22 : vector<64x1xf32> to vector<64x128xf32>
    %24 = arith.mulf %19, %23 : vector<64x128xf32>
    %25 = vector.extract_strided_slice %8 {offsets = [0, 0], sizes = [64, 128], strides = [1, 1]} : vector<64x640xbf16> to vector<64x128xbf16>
    %c0_13 = arith.constant 0 : index
    %c0_14 = arith.constant 0 : index
    %c0_15 = arith.constant 0 : index
    %26 = vector.load %arg4[%c0_13, %c0_14, %c0_15] : memref<4x128x128xbf16, #tpu.memory_space<vmem>>, vector<1x128x128xbf16>
    %27 = vector.shape_cast %26 : vector<1x128x128xbf16> to vector<128x128xbf16>
    %cst_16 = arith.constant dense<0.000000e+00> : vector<64x128xf32>
    %28 = tpu.matmul %25, %27, %cst_16 {dimension_numbers = #tpu.dot_dimension_numbers<[1], [0], [0], [1], [0, 0, 1, 1], [], []>} : vector<64x128xbf16>, vector<128x128xbf16>, vector<64x128xf32> -> vector<64x128xf32>
    %c0_17 = arith.constant 0 : index
    %c0_18 = arith.constant 0 : index
    %29 = vector.load %arg5[%c0_17, %c0_18] : memref<1x512xf32, #tpu.memory_space<vmem>>, vector<1x128xf32>
    %30 = vector.broadcast %29 : vector<1x128xf32> to vector<64x128xf32>
    %31 = arith.addf %28, %30 : vector<64x128xf32>
    %cst_19 = arith.constant 0.000000e+00 : f32
    %32 = vector.broadcast %cst_19 : f32 to vector<64x128xf32>
    %33 = arith.maximumf %31, %32 : vector<64x128xf32>
    %34 = vector.extract_strided_slice %24 {offsets = [0, 0], sizes = [64, 1], strides = [1, 1]} : vector<64x128xf32> to vector<64x1xf32>
    %35 = vector.broadcast %34 : vector<64x1xf32> to vector<64x128xf32>
    %36 = arith.mulf %35, %33 : vector<64x128xf32>
    %37 = vector.extract_strided_slice %8 {offsets = [0, 128], sizes = [64, 128], strides = [1, 1]} : vector<64x640xbf16> to vector<64x128xbf16>
    %c1 = arith.constant 1 : index
    %c0_20 = arith.constant 0 : index
    %c0_21 = arith.constant 0 : index
    %38 = vector.load %arg4[%c1, %c0_20, %c0_21] : memref<4x128x128xbf16, #tpu.memory_space<vmem>>, vector<1x128x128xbf16>
    %39 = vector.shape_cast %38 : vector<1x128x128xbf16> to vector<128x128xbf16>
    %cst_22 = arith.constant dense<0.000000e+00> : vector<64x128xf32>
    %40 = tpu.matmul %37, %39, %cst_22 {dimension_numbers = #tpu.dot_dimension_numbers<[1], [0], [0], [1], [0, 0, 1, 1], [], []>} : vector<64x128xbf16>, vector<128x128xbf16>, vector<64x128xf32> -> vector<64x128xf32>
    %c0_23 = arith.constant 0 : index
    %c128 = arith.constant 128 : index
    %41 = vector.load %arg5[%c0_23, %c128] : memref<1x512xf32, #tpu.memory_space<vmem>>, vector<1x128xf32>
    %42 = vector.broadcast %41 : vector<1x128xf32> to vector<64x128xf32>
    %43 = arith.addf %40, %42 : vector<64x128xf32>
    %cst_24 = arith.constant 0.000000e+00 : f32
    %44 = vector.broadcast %cst_24 : f32 to vector<64x128xf32>
    %45 = arith.maximumf %43, %44 : vector<64x128xf32>
    %46 = vector.extract_strided_slice %24 {offsets = [0, 1], sizes = [64, 1], strides = [1, 1]} : vector<64x128xf32> to vector<64x1xf32>
    %47 = vector.broadcast %46 : vector<64x1xf32> to vector<64x128xf32>
    %48 = arith.mulf %47, %45 : vector<64x128xf32>
    %49 = arith.addf %36, %48 : vector<64x128xf32>
    %50 = vector.extract_strided_slice %8 {offsets = [0, 256], sizes = [64, 128], strides = [1, 1]} : vector<64x640xbf16> to vector<64x128xbf16>
    %c2 = arith.constant 2 : index
    %c0_25 = arith.constant 0 : index
    %c0_26 = arith.constant 0 : index
    %51 = vector.load %arg4[%c2, %c0_25, %c0_26] : memref<4x128x128xbf16, #tpu.memory_space<vmem>>, vector<1x128x128xbf16>
    %52 = vector.shape_cast %51 : vector<1x128x128xbf16> to vector<128x128xbf16>
    %cst_27 = arith.constant dense<0.000000e+00> : vector<64x128xf32>
    %53 = tpu.matmul %50, %52, %cst_27 {dimension_numbers = #tpu.dot_dimension_numbers<[1], [0], [0], [1], [0, 0, 1, 1], [], []>} : vector<64x128xbf16>, vector<128x128xbf16>, vector<64x128xf32> -> vector<64x128xf32>
    %c0_28 = arith.constant 0 : index
    %c256 = arith.constant 256 : index
    %54 = vector.load %arg5[%c0_28, %c256] : memref<1x512xf32, #tpu.memory_space<vmem>>, vector<1x128xf32>
    %55 = vector.broadcast %54 : vector<1x128xf32> to vector<64x128xf32>
    %56 = arith.addf %53, %55 : vector<64x128xf32>
    %cst_29 = arith.constant 0.000000e+00 : f32
    %57 = vector.broadcast %cst_29 : f32 to vector<64x128xf32>
    %58 = arith.maximumf %56, %57 : vector<64x128xf32>
    %59 = vector.extract_strided_slice %24 {offsets = [0, 2], sizes = [64, 1], strides = [1, 1]} : vector<64x128xf32> to vector<64x1xf32>
    %60 = vector.broadcast %59 : vector<64x1xf32> to vector<64x128xf32>
    %61 = arith.mulf %60, %58 : vector<64x128xf32>
    %62 = arith.addf %49, %61 : vector<64x128xf32>
    %63 = vector.extract_strided_slice %8 {offsets = [0, 384], sizes = [64, 128], strides = [1, 1]} : vector<64x640xbf16> to vector<64x128xbf16>
    %c3 = arith.constant 3 : index
    %c0_30 = arith.constant 0 : index
    %c0_31 = arith.constant 0 : index
    %64 = vector.load %arg4[%c3, %c0_30, %c0_31] : memref<4x128x128xbf16, #tpu.memory_space<vmem>>, vector<1x128x128xbf16>
    %65 = vector.shape_cast %64 : vector<1x128x128xbf16> to vector<128x128xbf16>
    %cst_32 = arith.constant dense<0.000000e+00> : vector<64x128xf32>
    %66 = tpu.matmul %63, %65, %cst_32 {dimension_numbers = #tpu.dot_dimension_numbers<[1], [0], [0], [1], [0, 0, 1, 1], [], []>} : vector<64x128xbf16>, vector<128x128xbf16>, vector<64x128xf32> -> vector<64x128xf32>
    %c0_33 = arith.constant 0 : index
    %c384 = arith.constant 384 : index
    %67 = vector.load %arg5[%c0_33, %c384] : memref<1x512xf32, #tpu.memory_space<vmem>>, vector<1x128xf32>
    %68 = vector.broadcast %67 : vector<1x128xf32> to vector<64x128xf32>
    %69 = arith.addf %66, %68 : vector<64x128xf32>
    %cst_34 = arith.constant 0.000000e+00 : f32
    %70 = vector.broadcast %cst_34 : f32 to vector<64x128xf32>
    %71 = arith.maximumf %69, %70 : vector<64x128xf32>
    %72 = vector.extract_strided_slice %24 {offsets = [0, 3], sizes = [64, 1], strides = [1, 1]} : vector<64x128xf32> to vector<64x1xf32>
    %73 = vector.broadcast %72 : vector<64x1xf32> to vector<64x128xf32>
    %74 = arith.mulf %73, %71 : vector<64x128xf32>
    %75 = arith.addf %62, %74 : vector<64x128xf32>
    %c0_35 = arith.constant 0 : index
    %c0_36 = arith.constant 0 : index
    %76 = vector.load %arg8[%c0_35, %c0_36] : memref<64x128xf32, #tpu.memory_space<vmem>>, vector<64x128xf32>
    tpu.vector_store %arg8[%c0_35, %c0_36], %75 {strides = array<i32>} : memref<64x128xf32, #tpu.memory_space<vmem>>, vector<64x128xf32>,
    return
  }
  func.func @transform_0(%arg0: i32) -> (i32, i32) {
    %c0_i32 = arith.constant 0 : i32
    %c0_i32_0 = arith.constant 0 : i32
    return %arg0, %c0_i32 : i32, i32
  }
  func.func @transform_1(%arg0: i32) -> (i32, i32) {
    %c0_i32 = arith.constant 0 : i32
    %c0_i32_0 = arith.constant 0 : i32
    %c0_i32_1 = arith.constant 0 : i32
    return %c0_i32, %c0_i32_0 : i32, i32
  }
  func.func @transform_2(%arg0: i32) -> (i32, i32) {
    %c0_i32 = arith.constant 0 : i32
    %c0_i32_0 = arith.constant 0 : i32
    %c0_i32_1 = arith.constant 0 : i32
    return %c0_i32, %c0_i32_0 : i32, i32
  }
  func.func @transform_3(%arg0: i32) -> (i32, i32, i32) {
    %c0_i32 = arith.constant 0 : i32
    %c0_i32_0 = arith.constant 0 : i32
    %c0_i32_1 = arith.constant 0 : i32
    %c0_i32_2 = arith.constant 0 : i32
    return %c0_i32, %c0_i32_0, %c0_i32_1 : i32, i32, i32
  }
  func.func @transform_4(%arg0: i32) -> (i32, i32) {
    %c0_i32 = arith.constant 0 : i32
    %c0_i32_0 = arith.constant 0 : i32
    %c0_i32_1 = arith.constant 0 : i32
    return %c0_i32, %c0_i32_0 : i32, i32
  }
  func.func @transform_5(%arg0: i32) -> (i32, i32) {
    %c0_i32 = arith.constant 0 : i32
    %c0_i32_0 = arith.constant 0 : i32
    %c0_i32_1 = arith.constant 0 : i32
    return %c0_i32, %c0_i32_0 : i32, i32
  }
  func.func @transform_6(%arg0: i32) -> (i32, i32) {
    %c0_i32 = arith.constant 0 : i32
    %c0_i32_0 = arith.constant 0 : i32
    %c0_i32_1 = arith.constant 0 : i32
    return %c0_i32, %c0_i32_0 : i32, i32
  }
  func.func @transform_7(%arg0: i32) -> (i32, i32) {
    %c0_i32 = arith.constant 0 : i32
    %c0_i32_0 = arith.constant 0 : i32
    return %arg0, %c0_i32 : i32, i32
  }
}

</mosaic_0001>

<bundles_post_ra>
// kernel: omoe_forward.1
= control target key start
LH: loop header
LB: loop body
LE: loop exit
PB: predicated region body
PF: predicated region fallthrough
CT: control target
= control target key end

     0   :  { %12 = vsyncpa [#allocation3], 0  ;;  %s2245_s24 = smov 0   ;;  %s2707_s0 = inlined_call_operand.vmem [shape: bf16[256,64], index: 0, kind: input, shape index: {}]   ;;  %s2708_s1 = inlined_call_operand.hbm [shape: bf16[64,640], index: 1, kind: input, shape index: {}]   ;;  %s2709_s2 = inlined_call_operand.vmem [shape: f32[1,640], index: 2, kind: input, shape index: {}]   ;;  %s2710_s3 = inlined_call_operand.vmem [shape: bf16[4,128,128], index: 3, kind: input, shape index: {}]   ;;  %s2711_s4 = inlined_call_operand.vmem [shape: f32[1,512], index: 4, kind: input, shape index: {}]   ;;  %s2712_s5 = inlined_call_operand.vmem [shape: bf16[128,128], index: 5, kind: input, shape index: {}]   ;;  %s2713_s6 = inlined_call_operand.vmem [shape: f32[1,128], index: 6, kind: input, shape index: {}]   ;;  %s2714_s7 = inlined_call_operand.vmem [shape: f32[256,128], index: 7, kind: output, shape index: {}]  }
   0x1 LB: > { %s212_s27 = sshll.u32 %s2708_s1, 4  ;;  %s1654_s28 = sadd.s32 4294967295, %s2196_s24   ;;  %s2196_s24 = sphi %s2245_s24, %s18_s24   ;;  %s213_s27 = int_to_ptr.hbm [resolvable:$true] %s212_s27 }
   0x2   : > { %p1656_p0 = scmp.ge.s32.totalorder %s2196_s24, 1  ;;  %p201_p1 = scmp.lt.s32.totalorder %s2196_s24, 5 }
   0x3   : > { %p2071_p2 = scmp.eq.s32.totalorder %s1654_s28, 0  ;;  %s2198_s29 = smov [#allocation2]  }
   0x4   : > { %p202_p3 = pnand %p1656_p0, %p201_p1  ;;  %s214_s30 = sshll.u32 %s2198_s29, 4  ;;  %s215_s30 = int_to_ptr.vmem [resolvable:$true] %s214_s30 }
   0x5   : > { %s2199_s8 = smov 320   ;;  %s2200_s9 = smov 20  }
   0x6   : > { %p2067_p4 = pneg %p202_p3  ;;  %254 = sbr.rel (%p202_p3) target bundleno = 808 (0x328), region = 48 }
   0x8   : > { %p2068_p5 = pnand %p2071_p2, %p2067_p4 }
   0xa   : > { %2070 = dma.hbm_to_vmem [thread:$0]  (!%p2068_p5), %s213_s27, 2560, %s215_s30, [#allocation3], %s2199_s8, %s2199_s8, %s2200_s9  }
   0xb   : > { %2191 = dma.done.wait (%p2071_p2), [#allocation3], 2560  }
   0xc   : > { %2193 = vsyncadd (%p2071_p2), [#allocation3], 4294964736  ;;  %s1661_s10 = sshll.u32 %s1654_s28, 3  ;;  %v1743_v0 = vld [vmem:[#allocation2 + $0x78] sm:$0xf]  ;;  %vm468_vm0 = vcmask 523264  }
   0xd   : > { %p288_p6 = scmp.lt.s32.totalorder %s1661_s10, 31  ;;  %v2012_v1 = vld [vmem:[#allocation2 + $0x88] sm:$0xf0]  ;;  %v2010_v2 = vld [vmem:[#allocation2 + $0x7c] sm:$0xf] }
   0xe   : > { %v1744_v3 = vor.u32 %v2012_v1, %v1743_v0  ;;  %v1745_v4 = vld [vmem:[#allocation2 + $0x8c] sm:$0xf0]  ;;  %v2007_v6 = vld [vmem:[#allocation2 + $0x60] sm:$0xf0]  ;;  %v2005_v8 = vld [vmem:[#allocation2 + $0x54] sm:$0xf] }
   0xf   : > { %v1723_v5 = vld [vmem:[#allocation2 + $0x50] sm:$0xf]  ;;  %v1748_v7 = vor.u32 %v2010_v2, %v1745_v4  ;;  %v1725_v9 = vld [vmem:[#allocation2 + $0x64] sm:$0xf0]  ;;  %s2716_s10 = smov (!%p288_p6, %s1661_s10), 31  ;;  %v2030_v0 = vld [vmem:[%s2710_s3 + $0x38] sm:$0xff] }
  0x10   : > { %485 = vmatpush.bf16.msra.mxu0 %v1744_v3  ;;  %v1724_v10 = vor.u32 %v2007_v6, %v1723_v5  ;;  %2055 = vmatpush.bf16.msra.mxu2 %v1744_v3  ;;  %v1728_v11 = vor.u32 %v2005_v8, %v1725_v9  ;;  %v1703_v12 = vld [vmem:[#allocation2 + $0x28] sm:$0xf]  ;;  %v2002_v13 = vld [vmem:[#allocation2 + $0x38] sm:$0xf0]  ;;  %v2000_v14 = vld [vmem:[#allocation2 + $0x2c] sm:$0xf] }
  0x11   : > { %514 = vmatpush.bf16.msra.mxu1 %v1748_v7  ;;  %2059 = vmatpush.bf16.msra.mxu3 %v1748_v7  ;;  %v1705_v15 = vld [vmem:[#allocation2 + $0x3c] sm:$0xf0]  ;;  %s1662_s11 = sshll.u32 %s2716_s10, 2  ;;  %v1704_v17 = vor.u32 %v2002_v13, %v1703_v12  ;;  %v1997_v18 = vld [vmem:[#allocation2 + $0x10] sm:$0xf0]  ;;  %v2038_v1 = vld [vmem:[%s2710_s3 + $0x78] sm:$0xff] }
  0x12   : > { %v1683_v16 = vld [vmem:[#allocation2] sm:$0xf]  ;;  %v1995_v19 = vld [vmem:[#allocation2 + $0x4] sm:$0xf]  ;;  %v1685_v20 = vld [vmem:[#allocation2 + $0x14] sm:$0xf0]  ;;  %v1708_v21 = vor.u32 %v2000_v14, %v1705_v15  ;;  %s2262_s14 = scalar_lea.vmem %s2707_s0, %s1662_s11 }
  0x13   : > { %v1759_v22 = vld [vmem:[#allocation2 + $0x88] sm:$0xf]  ;;  %v2014_v23 = vld [vmem:[#allocation2 + $0x98] sm:$0xf0]  ;;  %v1684_v24 = vor.u32 %v1997_v18, %v1683_v16  ;;  %v1688_v25 = vor.u32 %v1995_v19, %v1685_v20  ;;  %v1739_v27 = vld [vmem:[#allocation2 + $0x60] sm:$0xf] }
  0x14   : > { %486 = vmatpush.bf16.msra.mxu0 %v1724_v10  ;;  %2056 = vmatpush.bf16.msra.mxu2 %v1724_v10  ;;  %v1760_v26 = vor.u32 %v2014_v23, %v1759_v22  ;;  %v2009_v28 = vld [vmem:[#allocation2 + $0x70] sm:$0xf0]  ;;  %v2265_v29 = vld [vmem:[%s2262_s14] sm:$0xff]  ;;  %v1719_v31 = vld [vmem:[#allocation2 + $0x38] sm:$0xf]  ;;  %s1664_s23 = sshll.u32 %s2716_s10, 3 }
  0x15   : > { %515 = vmatpush.bf16.msra.mxu1 %v1728_v11  ;;  %2060 = vmatpush.bf16.msra.mxu3 %v1728_v11  ;;  %v1740_v30 = vor.u32 %v2009_v28, %v1739_v27  ;;  %v2004_v32 = vld [vmem:[#allocation2 + $0x48] sm:$0xf0]  ;;  %v2270_v33 = vld [vmem:[%s2262_s14 + $0x10] sm:$0xff]  ;;  %v1999_v36 = vld [vmem:[#allocation2 + $0x20] sm:$0xf0]  ;;  %s2663_s27 = scalar_lea.vmem %s2714_s7, %s1664_s23 }
  0x16   : > { %v1720_v34 = vor.u32 %v2004_v32, %v1719_v31  ;;  %v1699_v35 = vld [vmem:[#allocation2 + $0x10] sm:$0xf]  ;;  %v1992_v38 = vld [vmem:[%s2262_s14 + $0x8] sm:$0xff]  ;;  %v2281_v39 = vld [vmem:[%s2262_s14 + $0x18] sm:$0xff] }
  0x17   : > { %v1700_v37 = vor.u32 %v1999_v36, %v1699_v35  ;;  %v1751_v40 = vld [vmem:[#allocation2 + $0x80] sm:$0xf]  ;;  %v2013_v41 = vld [vmem:[#allocation2 + $0x90] sm:$0xf0]  ;;  %v2011_v42 = vld [vmem:[#allocation2 + $0x84] sm:$0xf] }
  0x18   : > { %487 = vmatpush.bf16.msra.mxu0 %v1704_v17  ;;  %2057 = vmatpush.bf16.msra.mxu2 %v1704_v17  ;;  %v1752_v43 = vor.u32 %v2013_v41, %v1751_v40  ;;  %v1753_v44 = vld [vmem:[#allocation2 + $0x94] sm:$0xf0]  ;;  %v2008_v46 = vld [vmem:[#allocation2 + $0x68] sm:$0xf0]  ;;  %v2006_v48 = vld [vmem:[#allocation2 + $0x5c] sm:$0xf] }
  0x19   : > { %516 = vmatpush.bf16.msra.mxu1 %v1708_v21  ;;  %2061 = vmatpush.bf16.msra.mxu3 %v1708_v21  ;;  %v1731_v45 = vld [vmem:[#allocation2 + $0x58] sm:$0xf]  ;;  %v1756_v47 = vor.u32 %v2011_v42, %v1753_v44  ;;  %v1733_v49 = vld [vmem:[#allocation2 + $0x6c] sm:$0xf0]  ;;  %v2003_v53 = vld [vmem:[#allocation2 + $0x40] sm:$0xf0] }
  0x1a   : > { %v1732_v50 = vor.u32 %v2008_v46, %v1731_v45  ;;  %v1736_v51 = vor.u32 %v2006_v48, %v1733_v49  ;;  %v1711_v52 = vld [vmem:[#allocation2 + $0x30] sm:$0xf]  ;;  %v2001_v54 = vld [vmem:[#allocation2 + $0x34] sm:$0xf]  ;;  %v1713_v55 = vld [vmem:[#allocation2 + $0x44] sm:$0xf0] }
  0x1b   : > { %v1712_v56 = vor.u32 %v2003_v53, %v1711_v52  ;;  %v1716_v57 = vor.u32 %v2001_v54, %v1713_v55  ;;  %v1691_v58 = vld [vmem:[#allocation2 + $0x8] sm:$0xf]  ;;  %v1998_v59 = vld [vmem:[#allocation2 + $0x18] sm:$0xf0]  ;;  %v1996_v60 = vld [vmem:[#allocation2 + $0xc] sm:$0xf] }
  0x1c   : > { %488 = vmatpush.bf16.msra.mxu0 %v1684_v24  ;;  %2058 = vmatpush.bf16.msra.mxu2 %v1684_v24  ;;  %v1693_v61 = vld [vmem:[#allocation2 + $0x1c] sm:$0xf0]  ;;  %v1692_v62 = vor.u32 %v1998_v59, %v1691_v58  ;;  %v2029_v2 = vld [vmem:[%s2710_s3 + $0x30] sm:$0xff]  ;;  %v2028_v4 = vld [vmem:[%s2710_s3 + $0x28] sm:$0xff] }
  0x1d   : > { %517 = vmatpush.bf16.msra.mxu1 %v1688_v25  ;;  %2062 = vmatpush.bf16.msra.mxu3 %v1688_v25  ;;  %v1696_v63 = vor.u32 %v1996_v60, %v1693_v61  ;;  %v2037_v3 = vld [vmem:[%s2710_s3 + $0x70] sm:$0xff]  ;;  %v2036_v5 = vld [vmem:[%s2710_s3 + $0x68] sm:$0xff]  ;;  %v2027_v6 = vld [vmem:[%s2710_s3 + $0x20] sm:$0xff] }
  0x1e   : > { %v2035_v7 = vld [vmem:[%s2710_s3 + $0x60] sm:$0xff]  ;;  %v2026_v8 = vld [vmem:[%s2710_s3 + $0x18] sm:$0xff]  ;;  %v2025_v10 = vld [vmem:[%s2710_s3 + $0x10] sm:$0xff] }
  0x1f   : > { %1761 = vmatmul.msk.bf16.vlgmr.msra.gmra.mxu0 %vm468_vm0, %v2265_v29  ;;  %1763 = vmatmul.msk.bf16.vlgmr.msra.gmra.mxu2 %vm468_vm0, %v2270_v33  ;;  %v2034_v9 = vld [vmem:[%s2710_s3 + $0x58] sm:$0xff]  ;;  %v2033_v11 = vld [vmem:[%s2710_s3 + $0x50] sm:$0xff]  ;;  %v2024_v12 = vld [vmem:[%s2710_s3 + $0x8] sm:$0xff] }
  0x20   : > { %601 = vmatpush.bf16.msrb.mxu0 %v1760_v26  ;;  %1765 = vmatmul.msk.bf16.vlgmr.msra.gmra.mxu1 %vm468_vm0, %v2265_v29  ;;  %v2032_v13 = vld [vmem:[%s2710_s3 + $0x48] sm:$0xff]  ;;  %v2023_v14 = vld [vmem:[%s2710_s3] sm:$0xff]  ;;  %v2022_v16 = vld [vmem:[%s2712_s5 + $0x38] sm:$0xff] }
  0x21   : > { %1767 = vmatmul.msk.bf16.vlgmr.msra.gmra.mxu3 %vm468_vm0, %v2270_v33  ;;  %543 = vmatpush.bf16.msrb.mxu2 %v1752_v43  ;;  %v2031_v15 = vld [vmem:[%s2710_s3 + $0x40] sm:$0xff]  ;;  %v2021_v17 = vld [vmem:[%s2712_s5 + $0x30] sm:$0xff]  ;;  %v2020_v18 = vld [vmem:[%s2712_s5 + $0x28] sm:$0xff] }
  0x22   : > { %572 = vmatpush.bf16.msrb.mxu3 %v1756_v47  ;;  %782 = vmatpush.bf16.msrb.mxu1 %v2022_v16  ;;  %v2369_v19 = vld [vmem:[%s2709_s2] sm:$0x1f]  ;;  %v2018_v25 = vld [vmem:[%s2712_s5 + $0x18] sm:$0xff]  ;;  %v2017_v28 = vld [vmem:[%s2712_s5 + $0x10] sm:$0xff] }
  0x23   : > { %v2019_v20 = vld [vmem:[%s2712_s5 + $0x20] sm:$0xff]  ;;  %v2375_v21 = vperm.slane %v2369_v19, 0  ;;  %v2378_v23 = vperm.slane %v2369_v19, 1  ;;  %v2016_v36 = vld [vmem:[%s2712_s5 + $0x8] sm:$0xff] }
  0x24   : > { %602 = vmatpush.bf16.msrb.mxu0 %v1740_v30  ;;  %v2015_v40 = vld [vmem:[%s2712_s5] sm:$0xff] }
  0x25   : > { %544 = vmatpush.bf16.msrb.mxu2 %v1732_v50 }
  0x26   : > { %573 = vmatpush.bf16.msrb.mxu3 %v1736_v51  ;;  %783 = vmatpush.bf16.msrb.mxu1 %v2021_v17 }
  0x28   : > { %603 = vmatpush.bf16.msrb.mxu0 %v1720_v34 }
  0x29   : > { %545 = vmatpush.bf16.msrb.mxu2 %v1712_v56 }
  0x2a   : > { %574 = vmatpush.bf16.msrb.mxu3 %v1716_v57  ;;  %784 = vmatpush.bf16.msrb.mxu1 %v2020_v18 }
  0x2c   : > { %604 = vmatpush.bf16.msrb.mxu0 %v1700_v37 }
  0x2d   : > { %546 = vmatpush.bf16.msrb.mxu2 %v1692_v62 }
  0x2e   : > { %575 = vmatpush.bf16.msrb.mxu3 %v1696_v63  ;;  %785 = vmatpush.bf16.msrb.mxu1 %v2019_v20 }
  0x2f   : > { %1762 = vmatmul.msk.bf16.gmra.mxu0 %vm468_vm0, %v1992_v38  ;;  %1764 = vmatmul.msk.bf16.gmra.mxu2 %vm468_vm0, %v2281_v39 }
  0x30   : > { %1766 = vmatmul.msk.bf16.gmra.mxu1 %vm468_vm0, %v1992_v38 }
  0x31   : > { %1768 = vmatmul.msk.bf16.gmra.mxu3 %vm468_vm0, %v2281_v39  ;;  %975 = vmatpush.bf16.msra.mxu2 %v2030_v0 }
  0x32   : > { %1145 = vmatpush.bf16.msra.mxu3 %v2038_v1  ;;  %786 = vmatpush.bf16.msrb.mxu1 %v2018_v25 }
  0x35   : > { %976 = vmatpush.bf16.msra.mxu2 %v2029_v2 }
  0x36   : > { %1146 = vmatpush.bf16.msra.mxu3 %v2037_v3  ;;  %787 = vmatpush.bf16.msrb.mxu1 %v2017_v28 }
  0x39   : > { %977 = vmatpush.bf16.msra.mxu2 %v2028_v4  ;;  %v2405_v4 = vperm.slane %v2369_v19, 4 }
  0x3a   : > { %1147 = vmatpush.bf16.msra.mxu3 %v2036_v5  ;;  %788 = vmatpush.bf16.msrb.mxu1 %v2016_v36 }
  0x3d   : > { %978 = vmatpush.bf16.msra.mxu2 %v2027_v6 }
  0x3e   : > { %1148 = vmatpush.bf16.msra.mxu3 %v2035_v7  ;;  %789 = vmatpush.bf16.msrb.mxu1 %v2015_v40 }
  0x3f   : > { %1777 = vmatmul.msk.bf16.vlgmr.msrb.gmra.mxu0 %vm468_vm0, %v2265_v29  ;;  %1769 = vmatmul.msk.bf16.vlgmr.msrb.gmra.mxu2 %vm468_vm0, %v2265_v29 }
  0x41   : > { %1773 = vmatmul.msk.bf16.vlgmr.msrb.gmra.mxu3 %vm468_vm0, %v2265_v29  ;;  %979 = vmatpush.bf16.msra.mxu2 %v2026_v8 }
  0x42   : > { %1149 = vmatpush.bf16.msra.mxu3 %v2034_v9 }
  0x45   : > { %980 = vmatpush.bf16.msra.mxu2 %v2025_v10 }
  0x46   : > { %1150 = vmatpush.bf16.msra.mxu3 %v2033_v11 }
  0x49   : > { %981 = vmatpush.bf16.msra.mxu2 %v2024_v12 }
  0x4a   : > { %1151 = vmatpush.bf16.msra.mxu3 %v2032_v13 }
  0x4d   : > { %982 = vmatpush.bf16.msra.mxu2 %v2023_v14 }
  0x4e   : > { %1152 = vmatpush.bf16.msra.mxu3 %v2031_v15 }
  0x4f   : > { %1778 = vmatmul.msk.bf16.gmra.mxu0 %vm468_vm0, %v1992_v38  ;;  %1770 = vmatmul.msk.bf16.gmra.mxu2 %vm468_vm0, %v1992_v38 }
  0x51   : > { %1774 = vmatmul.msk.bf16.gmra.mxu3 %vm468_vm0, %v1992_v38 }
  0x5f   : > { %1779 = vmatmul.msk.bf16.gmra.mxu0 %vm468_vm0, %v2270_v33  ;;  %1771 = vmatmul.msk.bf16.gmra.mxu2 %vm468_vm0, %v2270_v33 }
  0x61   : > { %1775 = vmatmul.msk.bf16.gmra.mxu3 %vm468_vm0, %v2270_v33 }
  0x6f   : > { %1780 = vmatmul.msk.bf16.gmra.mxu0 %vm468_vm0, %v2281_v39  ;;  %1772 = vmatmul.msk.bf16.gmra.mxu2 %vm468_vm0, %v2281_v39 }
  0x71   : > { %1776 = vmatmul.msk.bf16.gmra.mxu3 %vm468_vm0, %v2281_v39 }
  0x9c   : > { %v490_v22 = vpop.f32.mrf.mxu0 }
  0x9d   : > { %v519_v24 = vpop.f32.mrf.mxu1  ;;  %v491_v26 = vadd.f32 %v490_v22, %v2375_v21 }
  0x9e   : > { %v520_v27 = vadd.f32 %v519_v24, %v2378_v23 }
  0x9f   : > { %v626_v29 = vmax.f32 %v491_v26, 0.0 }
  0xa0   : > { %v627_v30 = vmax.f32 %v520_v27, 0.0 }
  0xa2   : > { %v666_v37 = vpack.c.bf16 %v627_v30, %v626_v29  ;;  %v500_v53 = vpop.f32.mrf.mxu2 }
  0xa3   : > { %v501_v56 = vadd.f32 %v500_v53, %v2375_v21 }
  0xa4   : > { %v492_v31 = vpop.f32.mrf.mxu0  ;;  %v911_v41 = vunpack.c.l.b16 %v666_v37  ;;  %v1081_v42 = vunpack.c.h.b16 %v666_v37  ;;  %v529_v54 = vpop.f32.mrf.mxu3 }
  0xa5   : > { %v493_v32 = vadd.f32 %v492_v31, %v2375_v21  ;;  %v521_v33 = vpop.f32.mrf.mxu1  ;;  %v530_v57 = vadd.f32 %v529_v54, %v2378_v23  ;;  %v646_v61 = vmax.f32 %v501_v56, 0.0 }
  0xa6   : > { %v522_v34 = vadd.f32 %v521_v33, %v2378_v23 }
  0xa7   : > { %v631_v35 = vmax.f32 %v493_v32, 0.0  ;;  %v647_v62 = vmax.f32 %v530_v57, 0.0 }
  0xa8   : > { %v632_v38 = vmax.f32 %v522_v34, 0.0 }
  0xa9   : > { %v2402_v2 = vpack.c.bf16 %v647_v62, %v646_v61 }
  0xaa   : > { %v669_v39 = vpack.c.bf16 %v632_v38, %v631_v35  ;;  %v502_v7 = vpop.f32.mrf.mxu2 }
  0xab   : > { %v503_v12 = vadd.f32 %v502_v7, %v2375_v21 }
  0xac   : > { %v912_v43 = vunpack.c.l.b16 %v669_v39  ;;  %v1082_v44 = vunpack.c.h.b16 %v669_v39  ;;  %v495_v45 = vpop.f32.mrf.mxu0  ;;  %v531_v8 = vpop.f32.mrf.mxu3 }
  0xad   : > { %v524_v46 = vpop.f32.mrf.mxu1  ;;  %v496_v49 = vadd.f32 %v495_v45, %v2375_v21  ;;  %v532_v13 = vadd.f32 %v531_v8, %v2378_v23  ;;  %v651_v16 = vmax.f32 %v503_v12, 0.0 }
  0xae   : > { %v919_v47 = vpack.c.b16 %v912_v43, %v911_v41  ;;  %v1089_v48 = vpack.c.b16 %v1082_v44, %v1081_v42  ;;  %v525_v50 = vadd.f32 %v524_v46, %v2378_v23 }
  0xaf   : > { %v636_v51 = vmax.f32 %v496_v49, 0.0  ;;  %v652_v17 = vmax.f32 %v532_v13, 0.0 }
  0xb0   : > { %983 = vmatmul.bf16.vlgmr.msra.gmra.mxu2 %v919_v47  ;;  %1153 = vmatmul.bf16.vlgmr.msra.gmra.mxu3 %v1089_v48  ;;  %v637_v52 = vmax.f32 %v525_v50, 0.0 }
  0xb1   : > { %v2410_v20 = vpack.c.bf16 %v652_v17, %v651_v16 }
  0xb2   : > { %v672_v63 = vpack.c.bf16 %v637_v52, %v636_v51  ;;  %v505_v24 = vpop.f32.mrf.mxu2 }
  0xb3   : > { %v506_v27 = vadd.f32 %v505_v24, %v2375_v21 }
  0xb4   : > { %v497_v55 = vpop.f32.mrf.mxu0  ;;  %v913_v5 = vunpack.c.l.b16 %v672_v63  ;;  %v1083_v6 = vunpack.c.h.b16 %v672_v63  ;;  %v534_v25 = vpop.f32.mrf.mxu3 }
  0xb5   : > { %v498_v58 = vadd.f32 %v497_v55, %v2375_v21  ;;  %v526_v59 = vpop.f32.mrf.mxu1  ;;  %v535_v28 = vadd.f32 %v534_v25, %v2378_v23  ;;  %v656_v30 = vmax.f32 %v506_v27, 0.0 }
  0xb6   : > { %v527_v60 = vadd.f32 %v526_v59, %v2378_v23 }
  0xb7   : > { %v641_v0 = vmax.f32 %v498_v58, 0.0  ;;  %v657_v31 = vmax.f32 %v535_v28, 0.0 }
  0xb8   : > { %v642_v1 = vmax.f32 %v527_v60, 0.0 }
  0xb9   : > { %v2415_v34 = vpack.c.bf16 %v657_v31, %v656_v30  ;;  %v2452_v31 = vperm.slane %v2369_v19, 2 }
  0xba   : > { %v675_v3 = vpack.c.bf16 %v642_v1, %v641_v0  ;;  %v507_v38 = vpop.f32.mrf.mxu2 }
  0xbb   : > { %v508_v41 = vadd.f32 %v507_v38, %v2375_v21 }
  0xbc   : > { %v606_v9 = vpop.f32.mrf.mxu0  ;;  %v914_v10 = vunpack.c.l.b16 %v675_v3  ;;  %v1084_v11 = vunpack.c.h.b16 %v675_v3  ;;  %v536_v39 = vpop.f32.mrf.mxu3 }
  0xbd   : > { %v607_v18 = vadd.f32 %v606_v9, %v2405_v4  ;;  %v537_v42 = vadd.f32 %v536_v39, %v2378_v23  ;;  %v661_v45 = vmax.f32 %v508_v41, 0.0 }
  0xbe   : > { %v920_v14 = vpack.c.b16 %v914_v10, %v913_v5  ;;  %v1090_v15 = vpack.c.b16 %v1084_v11, %v1083_v6 }
  0xbf   : > { %v630_v22 = vmax.f32 %v607_v18, 0.0  ;;  %v662_v46 = vmax.f32 %v537_v42, 0.0 }
  0xc0   : > { %988 = vmatmul.bf16.gmra.mxu2 %v920_v14  ;;  %1158 = vmatmul.bf16.gmra.mxu3 %v1090_v15 }
  0xc1   : > { %v668_v32 = vpack.c.bf16 %v630_v22, %v630_v22  ;;  %v2420_v47 = vpack.c.bf16 %v662_v46, %v661_v45  ;;  %v2121_v46 = vld [vmem:[%s2713_s6] ss:$0 sm:$0xff] }
  0xc2   : > { %v2422_v49 = vpop.f32.mrf.mxu2 }
  0xc3   : > { %v718_v36 = vunpack.c.l.b16 %v668_v32  ;;  %v2455_v32 = vperm.slane %v2369_v19, 3 }
  0xc4   : > { %v608_v26 = vpop.f32.mrf.mxu0  ;;  %v2424_v51 = vpop.f32.mrf.mxu3 }
  0xc5   : > { %v609_v29 = vadd.f32 %v608_v26, %v2405_v4 }
  0xc7   : > { %v635_v33 = vmax.f32 %v609_v29, 0.0 }
  0xc9   : > { %v671_v35 = vpack.c.bf16 %v635_v33, %v635_v33 }
  0xca   : > { %v2427_v56 = vpop.f32.mrf.mxu2 }
  0xcb   : > { %v719_v37 = vunpack.c.l.b16 %v671_v35 }
  0xcc   : > { %v611_v40 = vpop.f32.mrf.mxu0  ;;  %v2429_v58 = vpop.f32.mrf.mxu3 }
  0xcd   : > { %v612_v43 = vadd.f32 %v611_v40, %v2405_v4  ;;  %v726_v44 = vpack.c.b16 %v719_v37, %v718_v36 }
  0xcf   : > { %790 = vmatmul.bf16.vlgmr.msrb.gmra.mxu1 %v726_v44  ;;  %v640_v48 = vmax.f32 %v612_v43, 0.0 }
  0xd1   : > { %v674_v52 = vpack.c.bf16 %v640_v48, %v640_v48 }
  0xd2   : > { %v2432_v62 = vpop.f32.mrf.mxu2 }
  0xd3   : > { %v720_v54 = vunpack.c.l.b16 %v674_v52 }
  0xd4   : > { %v613_v50 = vpop.f32.mrf.mxu0  ;;  %v2434_v0 = vpop.f32.mrf.mxu3 }
  0xd5   : > { %v614_v53 = vadd.f32 %v613_v50, %v2405_v4 }
  0xd7   : > { %v645_v21 = vmax.f32 %v614_v53, 0.0 }
  0xd9   : > { %v677_v23 = vpack.c.bf16 %v645_v21, %v645_v21 }
  0xda   : > { %v2437_v9 = vpop.f32.mrf.mxu2 }
  0xdb   : > { %v721_v55 = vunpack.c.l.b16 %v677_v23 }
  0xdc   : > { %v616_v57 = vpop.f32.mrf.mxu0  ;;  %v2439_v11 = vpop.f32.mrf.mxu3 }
  0xdd   : > { %v617_v59 = vadd.f32 %v616_v57, %v2405_v4  ;;  %v727_v60 = vpack.c.b16 %v721_v55, %v720_v54 }
  0xdf   : > { %795 = vmatmul.bf16.gmra.mxu1 %v727_v60  ;;  %v650_v61 = vmax.f32 %v617_v59, 0.0 }
  0xe1   : > { %v680_v1 = vpack.c.bf16 %v650_v61, %v650_v61 }
  0xe2   : > { %v2442_v15 = vpop.f32.mrf.mxu2 }
  0xe3   : > { %v722_v6 = vunpack.c.l.b16 %v680_v1 }
  0xe4   : > { %v618_v63 = vpop.f32.mrf.mxu0  ;;  %v2444_v17 = vpop.f32.mrf.mxu3 }
  0xe5   : > { %v619_v3 = vadd.f32 %v618_v63, %v2405_v4 }
  0xe7   : > { %v655_v5 = vmax.f32 %v619_v3, 0.0 }
  0xe9   : > { %v683_v7 = vpack.c.bf16 %v655_v5, %v655_v5 }
  0xea   : > { %v2447_v28 = vpop.f32.mrf.mxu2 }
  0xeb   : > { %v723_v8 = vunpack.c.l.b16 %v683_v7 }
  0xec   : > { %v621_v10 = vpop.f32.mrf.mxu0  ;;  %v2449_v29 = vpop.f32.mrf.mxu3 }
  0xed   : > { %v622_v12 = vadd.f32 %v621_v10, %v2405_v4  ;;  %v728_v13 = vpack.c.b16 %v723_v8, %v722_v6 }
  0xef   : > { %800 = vmatmul.bf16.gmra.mxu1 %v728_v13  ;;  %v660_v14 = vmax.f32 %v622_v12, 0.0 }
  0xf1   : > { %v686_v18 = vpack.c.bf16 %v660_v14, %v660_v14 }
  0xf2   : > { %v563_v33 = vpop.f32.mrf.mxu2 }
  0xf3   : > { %v724_v25 = vunpack.c.l.b16 %v686_v18  ;;  %v564_v35 = vadd.f32 %v563_v33, %v2452_v31 }
  0xf4   : > { %v623_v16 = vpop.f32.mrf.mxu0 }
  0xf5   : > { %v624_v22 = vadd.f32 %v623_v16, %v2405_v4  ;;  %v592_v4 = vpop.f32.mrf.mxu3  ;;  %v658_v37 = vmax.f32 %v564_v35, 0.0 }
  0xf6   : > { %v593_v36 = vadd.f32 %v592_v4, %v2455_v32 }
  0xf7   : > { %v665_v24 = vmax.f32 %v624_v22, 0.0 }
  0xf8   : > { %v659_v38 = vmax.f32 %v593_v36, 0.0 }
  0xf9   : > { %v689_v26 = vpack.c.bf16 %v665_v24, %v665_v24 }
  0xfa   : > { %v2459_v39 = vpack.c.bf16 %v659_v38, %v658_v37  ;;  %v565_v40 = vpop.f32.mrf.mxu2  ;;  %v2046_v37 = vld [vmem:[%s2710_s3 + $0xb8] sm:$0xff] }
  0xfb   : > { %v725_v27 = vunpack.c.l.b16 %v689_v26  ;;  %v566_v41 = vadd.f32 %v565_v40, %v2452_v31  ;;  %v2054_v38 = vld [vmem:[%s2710_s3 + $0xf8] sm:$0xff]  ;;  %v915_v40 = vunpack.c.l.b16 %v2402_v2  ;;  %1323 = vmatpush.bf16.msra.mxu0 %v2046_v37  ;;  %v2039_v37 = vld [vmem:[%s2710_s3 + $0x80] sm:$0xff] }
  0xfc   : > { %1493 = vmatpush.bf16.msra.mxu1 %v2054_v38  ;;  %v2047_v38 = vld [vmem:[%s2710_s3 + $0xc0] sm:$0xff] }
  0xfd   : > { %v729_v30 = vpack.c.b16 %v725_v27, %v724_v25  ;;  %v594_v42 = vpop.f32.mrf.mxu3  ;;  %v663_v44 = vmax.f32 %v566_v41, 0.0  ;;  %v916_v41 = vunpack.c.l.b16 %v2410_v20 }
  0xfe   : > { %v595_v43 = vadd.f32 %v594_v42, %v2455_v32  ;;  %v1085_v42 = vunpack.c.h.b16 %v2402_v2  ;;  %v2044_v2 = vld [vmem:[%s2710_s3 + $0xa8] sm:$0xff] }
  0xff   : > { %805 = vmatmul.bf16.gmra.mxu1 %v729_v30 }
 0x100   : > { %v664_v45 = vmax.f32 %v595_v43, 0.0  ;;  %v2045_v43 = vld [vmem:[%s2710_s3 + $0xb0] sm:$0xff] }
 0x101   : > { %1324 = vmatpush.bf16.msra.mxu0 %v2045_v43  ;;  %v556_v43 = vadd.f32 %v2437_v9, %v2452_v31 }
 0x102   : > { %v2463_v19 = vpack.c.bf16 %v664_v45, %v663_v44  ;;  %v1086_v44 = vunpack.c.h.b16 %v2410_v20  ;;  %v2053_v45 = vld [vmem:[%s2710_s3 + $0xf0] sm:$0xff]  ;;  %v2052_v20 = vld [vmem:[%s2710_s3 + $0xe8] sm:$0xff] }
 0x103   : > { %1494 = vmatpush.bf16.msra.mxu1 %v2053_v45 }
 0x105   : > { %1325 = vmatpush.bf16.msra.mxu0 %v2044_v2 }
 0x107   : > { %1495 = vmatpush.bf16.msra.mxu1 %v2052_v20 }
 0x14c   : > { %v791_v48 = vpop.f32.mrf.mxu1 }
 0x14d   : > { %v792_v50 = vadd.f32 %v2121_v46, %v791_v48 }
 0x14f   : > { %811 = vmax.xlane.f32.xlu0 %v792_v50 }
 0x154   : > { %v793_v52 = vpop.f32.mrf.mxu1 }
 0x155   : > { %v794_v53 = vadd.f32 %v2121_v46, %v793_v52 }
 0x157   : > { %813 = vmax.xlane.f32.xlu0 %v794_v53 }
 0x15c   : > { %v796_v21 = vpop.f32.mrf.mxu1 }
 0x15d   : > { %v797_v54 = vadd.f32 %v2121_v46, %v796_v21 }
 0x15f   : > { %815 = vmax.xlane.f32.xlu1 %v797_v54 }
 0x164   : > { %v798_v23 = vpop.f32.mrf.mxu1 }
 0x165   : > { %v799_v55 = vadd.f32 %v2121_v46, %v798_v23  ;;  %v2051_v23 = vld [vmem:[%s2710_s3 + $0xe0] sm:$0xff] }
 0x166   : > { %1496 = vmatpush.bf16.msra.mxu1 %v2051_v23  ;;  %v1087_v23 = vunpack.c.h.b16 %v2415_v34 }
 0x167   : > { %817 = vmax.xlane.f32.xlu1 %v799_v55 }
 0x16c   : > { %v801_v57 = vpop.f32.mrf.mxu1 }
 0x16d   : > { %v802_v59 = vadd.f32 %v2121_v46, %v801_v57 }
 0x16f   : > { %819 = vmax.xlane.f32.xlu2 %v802_v59 }
 0x174   : > { %v803_v60 = vpop.f32.mrf.mxu1 }
 0x175   : > { %v804_v61 = vadd.f32 %v2121_v46, %v803_v60  ;;  %v551_v60 = vadd.f32 %v2427_v56, %v2452_v31 }
 0x177   : > { %821 = vmax.xlane.f32.xlu2 %v804_v61 }
 0x17c   : > { %v806_v63 = vpop.f32.mrf.mxu1 }
 0x17d   : > { %v2468_v1 = vadd.f32 %v2121_v46, %v806_v63 }
 0x17f   : > { %823 = vmax.xlane.f32.xlu0 %v2468_v1 }
 0x184   : > { %v808_v3 = vpop.f32.mrf.mxu1 }
 0x185   : > { %v2471_v5 = vadd.f32 %v2121_v46, %v808_v3  ;;  %v921_v46 = vpack.c.b16 %v916_v41, %v915_v40  ;;  %v2042_v3 = vld [vmem:[%s2710_s3 + $0x98] sm:$0xff]  ;;  %v554_v40 = vadd.f32 %v2432_v62, %v2452_v31  ;;  %v643_v62 = vmax.f32 %v556_v43, 0.0 }
 0x186   : > { %v2204_v43 = vmov 3  }
 0x187   : > { %825 = vmax.xlane.f32.xlu1 %v2471_v5  ;;  %993 = vmatmul.bf16.gmra.mxu2 %v921_v46 }
 0x1c2   : > { %v812_v6 = vpop.xlane.xlu0 %811 }
 0x1c3   : > { %v827_v7 = vsub.f32 %v792_v50, %v812_v6  ;;  %v1091_v50 = vpack.c.b16 %v1086_v44, %v1085_v42  ;;  %v583_v42 = vadd.f32 %v2434_v0, %v2455_v32  ;;  %v585_v44 = vadd.f32 %v2439_v11, %v2455_v32 }
 0x1c4   : > { %v917_v11 = vunpack.c.l.b16 %v2415_v34  ;;  %v588_v34 = vadd.f32 %v2444_v17, %v2455_v32 }
 0x1c5   : > { %v835_v8 = vmul.f32 1.442695, %v827_v7  ;;  %1163 = vmatmul.bf16.gmra.mxu3 %v1091_v50  ;;  %v639_v50 = vmax.f32 %v583_v42, 0.0 }
 0x1c7   : > { %2124 = vpow2.f32 %v835_v8 }
 0x1ca   : > { %v814_v10 = vpop.xlane.xlu0 %813 }
 0x1cb   : > { %v828_v12 = vsub.f32 %v794_v53, %v814_v10  ;;  %v2049_v10 = vld [vmem:[%s2710_s3 + $0xd0] sm:$0xff] }
 0x1cd   : > { %v2474_v13 = vpop.eup %2124  ;;  %v837_v14 = vmul.f32 1.442695, %v828_v12 }
 0x1ce   : > { %851 = vadd.xlane.f32.xlu2 %v2474_v13 }
 0x1cf   : > { %2126 = vpow2.f32 %v837_v14 }
 0x1d2   : > { %v816_v16 = vpop.xlane.xlu1 %815 }
 0x1d3   : > { %v829_v18 = vsub.f32 %v797_v54, %v816_v16  ;;  %v2043_v54 = vld [vmem:[%s2710_s3 + $0xa0] sm:$0xff] }
 0x1d4   : > { %1326 = vmatpush.bf16.msra.mxu0 %v2043_v54  ;;  %v918_v54 = vunpack.c.l.b16 %v2420_v47 }
 0x1d5   : > { %v2477_v22 = vpop.eup %2126  ;;  %v839_v24 = vmul.f32 1.442695, %v829_v18 }
 0x1d6   : > { %853 = vadd.xlane.f32.xlu0 %v2477_v22 }
 0x1d7   : > { %2128 = vpow2.f32 %v839_v24  ;;  %v2040_v24 = vld [vmem:[%s2710_s3 + $0x88] sm:$0xff] }
 0x1d8   : > { %1327 = vmatpush.bf16.msra.mxu0 %v2042_v3  ;;  %v2201_v3 = vmov 0  }
 0x1d9   : > { %2088 = vset.pattern.permute.xlu1 %v2201_v3  ;;  %2092 = vset.pattern.permute.xlu2 %v2201_v3 }
 0x1da   : > { %v818_v25 = vpop.xlane.xlu1 %817 }
 0x1db   : > { %v830_v26 = vsub.f32 %v799_v55, %v818_v25  ;;  %v549_v55 = vadd.f32 %v2422_v49, %v2452_v31 }
 0x1dd   : > { %v2480_v27 = vpop.eup %2128  ;;  %v841_v30 = vmul.f32 1.442695, %v830_v26  ;;  %v628_v7 = vmax.f32 %v549_v55, 0.0  ;;  %v1088_v55 = vunpack.c.h.b16 %v2420_v47  ;;  %v561_v47 = vadd.f32 %v2447_v28, %v2452_v31 }
 0x1de   : > { %855 = vadd.xlane.f32.xlu1 %v2480_v27 }
 0x1df   : > { %2130 = vpow2.f32 %v841_v30  ;;  %v2048_v30 = vld [vmem:[%s2710_s3 + $0xc8] sm:$0xff] }
 0x1e2   : > { %v820_v33 = vpop.xlane.xlu2 %819 }
 0x1e3   : > { %v831_v35 = vsub.f32 %v802_v59, %v820_v33  ;;  %v578_v59 = vadd.f32 %v2424_v51, %v2455_v32  ;;  %v2050_v51 = vld [vmem:[%s2710_s3 + $0xd8] sm:$0xff] }
 0x1e4   : > { %1497 = vmatpush.bf16.msra.mxu1 %v2050_v51  ;;  %v590_v51 = vadd.f32 %v2449_v29, %v2455_v32 }
 0x1e5   : > { %v2483_v4 = vpop.eup %2130  ;;  %v843_v36 = vmul.f32 1.442695, %v831_v35  ;;  %v629_v56 = vmax.f32 %v578_v59, 0.0 }
 0x1e6   : > { %857 = vadd.xlane.f32.xlu2 %v2483_v4 }
 0x1e7   : > { %2132 = vpow2.f32 %v843_v36  ;;  %v667_v14 = vpack.c.bf16 %v629_v56, %v628_v7  ;;  %v2202_v7 = vmov 1  }
 0x1e8   : > { %1498 = vmatpush.bf16.msra.mxu1 %v2049_v10  ;;  %2093 = vset.pattern.permute.xlu0 %v2202_v7 }
 0x1e9   : > { %v1259_v33 = vunpack.c.l.b16 %v667_v14  ;;  %v1429_v36 = vunpack.c.h.b16 %v667_v14 }
 0x1ea   : > { %v822_v48 = vpop.xlane.xlu2 %821 }
 0x1eb   : > { %v832_v52 = vsub.f32 %v804_v61, %v822_v48  ;;  %v580_v61 = vadd.f32 %v2429_v58, %v2455_v32  ;;  %v633_v58 = vmax.f32 %v551_v60, 0.0  ;;  %v638_v48 = vmax.f32 %v554_v40, 0.0 }
 0x1ec   : > { %1499 = vmatpush.bf16.msra.mxu1 %v2048_v30  ;;  %v922_v60 = vpack.c.b16 %v918_v54, %v917_v11  ;;  %v1436_v40 = vunpack.c.h.b16 %v2463_v19  ;;  %v984_v11 = vpop.f32.mrf.mxu2 }
 0x1ed   : > { %v2505_v53 = vpop.eup %2132  ;;  %v845_v21 = vmul.f32 1.442695, %v832_v52  ;;  %v634_v8 = vmax.f32 %v580_v61, 0.0  ;;  %v644_v52 = vmax.f32 %v585_v44, 0.0  ;;  %v673_v0 = vpack.c.bf16 %v639_v50, %v638_v48 }
 0x1ee   : > { %859 = vadd.xlane.f32.xlu0 %v2505_v53  ;;  %v1092_v61 = vpack.c.b16 %v1088_v55, %v1087_v23  ;;  %998 = vmatmul.bf16.gmra.mxu2 %v922_v60 }
 0x1ef   : > { %2134 = vpow2.f32 %v845_v21  ;;  %v670_v16 = vpack.c.bf16 %v634_v8, %v633_v58  ;;  %v676_v2 = vpack.c.bf16 %v644_v52, %v643_v62  ;;  %v1261_v21 = vunpack.c.l.b16 %v673_v0 }
 0x1f0   : > { %1500 = vmatpush.bf16.msra.mxu1 %v2047_v38  ;;  %1168 = vmatmul.bf16.gmra.mxu3 %v1092_v61  ;;  %v649_v58 = vmax.f32 %v588_v34, 0.0  ;;  %v653_v8 = vmax.f32 %v561_v47, 0.0  ;;  %v2203_v38 = vmov 2  }
 0x1f1   : > { %v1260_v35 = vunpack.c.l.b16 %v670_v16  ;;  %v1262_v9 = vunpack.c.l.b16 %v676_v2  ;;  %v1432_v59 = vunpack.c.h.b16 %v676_v2 }
 0x1f2   : > { %v824_v57 = vpop.xlane.xlu0 %823 }
 0x1f3   : > { %v833_v63 = vsub.f32 %v2468_v1, %v824_v57  ;;  %v2041_v1 = vld [vmem:[%s2710_s3 + $0x90] sm:$0xff]  ;;  %v1267_v41 = vpack.c.b16 %v1260_v35, %v1259_v33  ;;  %v1268_v20 = vpack.c.b16 %v1262_v9, %v1261_v21  ;;  %v1431_v57 = vunpack.c.h.b16 %v673_v0 }
 0x1f4   : > { %1328 = vmatpush.bf16.msra.mxu0 %v2041_v1  ;;  %v654_v1 = vmax.f32 %v590_v51, 0.0  ;;  %v1265_v35 = vunpack.c.l.b16 %v2459_v39 }
 0x1f5   : > { %v2529_v6 = vpop.eup %2134  ;;  %v847_v49 = vmul.f32 1.442695, %v833_v63  ;;  %v1438_v63 = vpack.c.b16 %v1432_v59, %v1431_v57  ;;  %v2630_v59 = vld [vmem:[%s2711_s4 + $0x1] ss:$0 sm:$0xff] }
 0x1f6   : > { %861 = vadd.xlane.f32.xlu1 %v2529_v6 }
 0x1f7   : > { %2136 = vpow2.f32 %v847_v49  ;;  %v559_v49 = vadd.f32 %v2442_v15, %v2452_v31 }
 0x1f8   : > { %1329 = vmatpush.bf16.msra.mxu0 %v2040_v24 }
 0x1f9   : > { %v648_v56 = vmax.f32 %v559_v49, 0.0  ;;  %v986_v49 = vpop.f32.mrf.mxu2 }
 0x1fa   : > { %v826_v12 = vpop.xlane.xlu1 %825 }
 0x1fb   : > { %v834_v18 = vsub.f32 %v2471_v5, %v826_v12  ;;  %v1430_v5 = vunpack.c.h.b16 %v670_v16  ;;  %v679_v10 = vpack.c.bf16 %v649_v58, %v648_v56  ;;  %v682_v12 = vpack.c.bf16 %v654_v1, %v653_v8  ;;  %v2652_v8 = vld [vmem:[%s2711_s4 + $0x3] ss:$0 sm:$0xff] }
 0x1fc   : > { %1330 = vmatpush.bf16.msra.mxu0 %v2039_v37 }
 0x1fd   : > { %v2545_v25 = vpop.eup %2136  ;;  %v849_v26 = vmul.f32 1.442695, %v834_v18  ;;  %v1437_v45 = vpack.c.b16 %v1430_v5, %v1429_v36  ;;  %v1263_v14 = vunpack.c.l.b16 %v679_v10  ;;  %v1264_v15 = vunpack.c.l.b16 %v682_v12 }
 0x1fe   : > { %863 = vadd.xlane.f32.xlu2 %v2545_v25  ;;  %v1433_v29 = vunpack.c.h.b16 %v679_v10  ;;  %v1434_v32 = vunpack.c.h.b16 %v682_v12  ;;  %v1266_v36 = vunpack.c.l.b16 %v2463_v19 }
 0x1ff   : > { %2138 = vpow2.f32 %v849_v26  ;;  %1331 = vmatmul.bf16.vlgmr.msra.gmra.mxu0 %v1267_v41  ;;  %1501 = vmatmul.bf16.vlgmr.msra.gmra.mxu1 %v1437_v45  ;;  %v1269_v18 = vpack.c.b16 %v1264_v15, %v1263_v14 }
 0x200   : > { %v1439_v24 = vpack.c.b16 %v1434_v32, %v1433_v29 }
 0x205   : > { %v2565_v46 = vpop.eup %2138 }
 0x206   : > { %865 = vadd.xlane.f32.xlu0 %v2565_v46 }
 0x20f   : > { %1336 = vmatmul.bf16.gmra.mxu0 %v1268_v20  ;;  %1506 = vmatmul.bf16.gmra.mxu1 %v1438_v63  ;;  %v2637_v63 = vld [vmem:[%s2711_s4 + $0x2] ss:$0 sm:$0xff] }
 0x21f   : > { %1341 = vmatmul.bf16.gmra.mxu0 %v1269_v18  ;;  %1511 = vmatmul.bf16.gmra.mxu1 %v1439_v24 }
 0x241   : > { %v852_v16 = vpop.xlane.xlu2 %851 }
 0x242   : > { %2140 = vrcp.f32 %v852_v16 }
 0x248   : > { %v2141_v17 = vpop.eup %2140 }
 0x249   : > { %v854_v28 = vpop.xlane.xlu0 %853  ;;  %v875_v31 = vmul.f32 %v2141_v17, %v2474_v13  ;;  %v1270_v13 = vpack.c.b16 %v1266_v36, %v1265_v35 }
 0x24a   : > { %2142 = vrcp.f32 %v854_v28 }
 0x24b   : > { %1014 = vperm.xlu1 %2088, %v875_v31   ;;  %1346 = vmatmul.bf16.gmra.mxu0 %v1270_v13 }
 0x250   : > { %v2143_v26 = vpop.eup %2142 }
 0x251   : > { %v856_v30 = vpop.xlane.xlu1 %855  ;;  %v876_v33 = vmul.f32 %v2143_v26, %v2477_v22  ;;  %v1435_v22 = vunpack.c.h.b16 %v2459_v39 }
 0x252   : > { %2144 = vrcp.f32 %v856_v30 }
 0x253   : > { %2089 = vset.pattern.permute.xlu1 %v2202_v7  ;;  %1187 = vperm.xlu0 %2093, %v876_v33   ;;  %v1440_v41 = vpack.c.b16 %v1436_v40, %v1435_v22 }
 0x254   : > { %1019 = vperm.xlu2 %2092, %v876_v33   ;;  %1183 = vperm.xlu1 %2089, %v875_v31  }
 0x255   : > { %1516 = vmatmul.bf16.gmra.mxu1 %v1440_v41  ;;  %v989_v41 = vpop.f32.mrf.mxu2 }
 0x258   : > { %v2145_v5 = vpop.eup %2144 }
 0x259   : > { %v877_v37 = vmul.f32 %v2145_v5, %v2480_v27  ;;  %v858_v42 = vpop.xlane.xlu2 %857 }
 0x25a   : > { %2146 = vrcp.f32 %v858_v42 }
 0x25b   : > { %2094 = vset.pattern.permute.xlu0 %v2203_v38 }
 0x25c   : > { %2097 = vset.pattern.permute.xlu2 %v2202_v7  ;;  %2090 = vset.pattern.permute.xlu1 %v2203_v38 }
 0x25d   : > { %1365 = vperm.xlu0 %2094, %v876_v33   ;;  %1191 = vperm.xlu2 %2097, %v877_v37  }
 0x25e   : > { %1361 = vperm.xlu1 %2090, %v875_v31  }
 0x260   : > { %v2147_v39 = vpop.eup %2146 }
 0x261   : > { %v878_v19 = vmul.f32 %v2147_v39, %v2483_v4  ;;  %v860_v44 = vpop.xlane.xlu0 %859 }
 0x265   : > { %2095 = vset.pattern.permute.xlu0 %v2204_v43  ;;  %2098 = vset.pattern.permute.xlu2 %v2203_v38 }
 0x266   : > { %2091 = vset.pattern.permute.xlu1 %v2204_v43  ;;  %1535 = vperm.xlu0 %2095, %v876_v33  }
 0x267   : > { %1369 = vperm.xlu2 %2098, %v877_v37   ;;  %1531 = vperm.xlu1 %2091, %v875_v31  }
 0x269   : > { %v862_v62 = vpop.xlane.xlu1 %861 }
 0x26e   : > { %2096 = vset.pattern.permute.xlu0 %v2201_v3 }
 0x26f   : > { %2099 = vset.pattern.permute.xlu2 %v2204_v43  ;;  %2101 = vset.pattern.permute.xlu1 %v2202_v7 }
 0x270   : > { %1024 = vperm.xlu0 %2096, %v877_v37   ;;  %1539 = vperm.xlu2 %2099, %v877_v37  }
 0x271   : > { %1195 = vperm.xlu1 %2101, %v878_v19   ;;  %v864_v27 = vpop.xlane.xlu2 %863 }
 0x272   : > { %2148 = vrcp.f32 %v864_v27 }
 0x273   : > { %2150 = vrcp.f32 %v860_v44 }
 0x274   : > { %2152 = vrcp.f32 %v862_v62 }
 0x278   : > { %v2149_v45 = vpop.eup %2148  ;;  %2100 = vset.pattern.permute.xlu2 %v2201_v3  ;;  %2112 = vset.pattern.permute.xlu0 %v2202_v7 }
 0x279   : > { %2102 = vset.pattern.permute.xlu1 %v2203_v38  ;;  %1029 = vperm.xlu2 %2100, %v878_v19   ;;  %v881_v48 = vmul.f32 %v2149_v45, %v2545_v25  ;;  %v2151_v4 = vpop.eup %2150  ;;  %v866_v52 = vpop.xlane.xlu0 %865 }
 0x27a   : > { %1373 = vperm.xlu1 %2102, %v878_v19   ;;  %v879_v50 = vmul.f32 %v2151_v4, %v2505_v53  ;;  %v2153_v53 = vpop.eup %2152  ;;  %2154 = vrcp.f32 %v866_v52 }
 0x27b   : > { %1207 = vperm.xlu0 %2112, %v881_v48   ;;  %v880_v25 = vmul.f32 %v2153_v53, %v2529_v6 }
 0x27c   : > { %v1332_v54 = vpop.f32.mrf.mxu0  ;;  %v1502_v55 = vpop.f32.mrf.mxu1 }
 0x27d   : > { %v1333_v56 = vadd.f32 %v2637_v63, %v1332_v54  ;;  %v1503_v31 = vadd.f32 %v2652_v8, %v1502_v55 }
 0x27f   : > { %v1352_v28 = vmax.f32 %v1333_v56, 0.0  ;;  %v1522_v13 = vmax.f32 %v1503_v31, 0.0 }
 0x280   : > { %v2155_v0 = vpop.eup %2154 }
 0x281   : > { %2105 = vset.pattern.permute.xlu2 %v2202_v7  ;;  %v882_v2 = vmul.f32 %v2155_v0, %v2565_v46  ;;  %v1154_v46 = vpop.f32.mrf.mxu3 }
 0x282   : > { %2103 = vset.pattern.permute.xlu1 %v2204_v43  ;;  %1199 = vperm.xlu2 %2105, %v879_v50  }
 0x283   : > { %1543 = vperm.xlu1 %2103, %v878_v19   ;;  %2113 = vset.pattern.permute.xlu0 %v2203_v38 }
 0x284   : > { %1385 = vperm.xlu0 %2113, %v881_v48   ;;  %v1334_v34 = vpop.f32.mrf.mxu0  ;;  %v1504_v12 = vpop.f32.mrf.mxu1 }
 0x285   : > { %v1335_v51 = vadd.f32 %v2637_v63, %v1334_v34  ;;  %v1505_v18 = vadd.f32 %v2652_v8, %v1504_v12 }
 0x287   : > { %v1353_v16 = vmax.f32 %v1335_v51, 0.0  ;;  %v1523_v35 = vmax.f32 %v1505_v18, 0.0 }
 0x289   : > { %v1156_v60 = vpop.f32.mrf.mxu3 }
 0x28a   : > { %2106 = vset.pattern.permute.xlu2 %v2203_v38  ;;  %v1157_v47 = vadd.f32 %v2630_v59, %v1156_v60 }
 0x28b   : > { %2104 = vset.pattern.permute.xlu1 %v2201_v3  ;;  %1377 = vperm.xlu2 %2106, %v879_v50  }
 0x28c   : > { %1034 = vperm.xlu1 %2104, %v879_v50   ;;  %2117 = vset.pattern.permute.xlu0 %v2204_v43  ;;  %v1175_v15 = vmax.f32 %v1157_v47, 0.0  ;;  %v1337_v27 = vpop.f32.mrf.mxu0  ;;  %v1507_v4 = vpop.f32.mrf.mxu1 }
 0x28d   : > { %1555 = vperm.xlu0 %2117, %v881_v48   ;;  %v1338_v52 = vadd.f32 %v2637_v63, %v1337_v27  ;;  %v1508_v0 = vadd.f32 %v2652_v8, %v1507_v4 }
 0x28f   : > { %v1524_v54 = vmax.f32 %v1508_v0, 0.0 }
 0x291   : > { %v1159_v19 = vpop.f32.mrf.mxu3 }
 0x293   : > { %2107 = vset.pattern.permute.xlu2 %v2204_v43 }
 0x294   : > { %1547 = vperm.xlu2 %2107, %v879_v50   ;;  %2109 = vset.pattern.permute.xlu1 %v2202_v7  ;;  %v1339_v56 = vpop.f32.mrf.mxu0 }
 0x295   : > { %1203 = vperm.xlu1 %2109, %v880_v25  }
 0x29c   : > { %2108 = vset.pattern.permute.xlu2 %v2201_v3 }
 0x29d   : > { %1039 = vperm.xlu2 %2108, %v880_v25   ;;  %2110 = vset.pattern.permute.xlu1 %v2203_v38 }
 0x29e   : > { %1381 = vperm.xlu1 %2110, %v880_v25  }
 0x2a5   : > { %1049 = vperm.xlu2 %2108, %v882_v2  }
 0x2a6   : > { %2111 = vset.pattern.permute.xlu1 %v2201_v3  ;;  %v2642_v3 = vld [vmem:[%s2711_s4] ss:$0 sm:$0xff] }
 0x2a7   : > { %1044 = vperm.xlu1 %2111, %v881_v48   ;;  %v987_v58 = vadd.f32 %v2642_v3, %v986_v49  ;;  %v985_v10 = vadd.f32 %v2642_v3, %v984_v11  ;;  %v990_v53 = vadd.f32 %v2642_v3, %v989_v41 }
 0x2a9   : > { %v1005_v29 = vmax.f32 %v987_v58, 0.0  ;;  %v1004_v26 = vmax.f32 %v985_v10, 0.0  ;;  %v1340_v10 = vadd.f32 %v2637_v63, %v1339_v56 }
 0x2ad   : > { %2114 = vset.pattern.permute.xlu2 %v2202_v7  ;;  %v1155_v7 = vadd.f32 %v2630_v59, %v1154_v46 }
 0x2ae   : > { %1211 = vperm.xlu2 %2114, %v882_v2   ;;  %v1020_v6 = vpop.permute.xlu2 %1019 }
 0x2af   : > { %2116 = vset.pattern.permute.xlu1 %v2204_v43  ;;  %v1174_v17 = vmax.f32 %v1155_v7, 0.0  ;;  %v1053_v33 = vmul.f32 %v1020_v6, %v1005_v29  ;;  %v991_v7 = vpop.f32.mrf.mxu2 }
 0x2b0   : > { %1551 = vperm.xlu1 %2116, %v880_v25   ;;  %v1160_v25 = vadd.f32 %v2630_v59, %v1159_v19 }
 0x2b2   : > { %v1176_v6 = vmax.f32 %v1160_v25, 0.0 }
 0x2b6   : > { %2115 = vset.pattern.permute.xlu2 %v2203_v38 }
 0x2b7   : > { %1389 = vperm.xlu2 %2115, %v882_v2   ;;  %v2622_v21 = vpop.permute.xlu2 %1191 }
 0x2b8   : > { %v1216_v11 = vmul.f32 %v2622_v21, %v1176_v6  ;;  %v992_v21 = vadd.f32 %v2642_v3, %v991_v7 }
 0x2bd   : > { %v1015_v9 = vpop.permute.xlu1 %1014 }
 0x2be   : > { %v1052_v5 = vmul.f32 %v1015_v9, %v1004_v26  ;;  %v1354_v9 = vmax.f32 %v1338_v52, 0.0 }
 0x2bf   : > { %2118 = vset.pattern.permute.xlu2 %v2204_v43 }
 0x2c0   : > { %1559 = vperm.xlu2 %2118, %v882_v2   ;;  %v1006_v2 = vmax.f32 %v990_v53, 0.0 }
 0x2c1   : > { %v2625_v20 = vpop.permute.xlu2 %1369 }
 0x2c2   : > { %v1394_v60 = vmul.f32 %v2625_v20, %v1354_v9  ;;  %v1509_v20 = vpop.f32.mrf.mxu1 }
 0x2c5   : > { %v1188_v23 = vpop.permute.xlu0 %1187 }
 0x2c6   : > { %v1184_v57 = vpop.permute.xlu1 %1183  ;;  %v1215_v32 = vmul.f32 %v1188_v23, %v1175_v15 }
 0x2c7   : > { %v1214_v30 = vmul.f32 %v1184_v57, %v1174_v17  ;;  %v1161_v57 = vpop.f32.mrf.mxu3  ;;  %v1007_v17 = vmax.f32 %v992_v21, 0.0 }
 0x2c8   : > { %v1223_v38 = vadd.f32 %v1215_v32, %v1053_v33  ;;  %v1342_v32 = vpop.f32.mrf.mxu0 }
 0x2c9   : > { %v1222_v22 = vadd.f32 %v1214_v30, %v1052_v5 }
 0x2ca   : > { %v2632_v61 = vpop.permute.xlu2 %1539 }
 0x2cb   : > { %v1564_v47 = vmul.f32 %v2632_v61, %v1524_v54  ;;  %v1510_v61 = vadd.f32 %v2652_v8, %v1509_v20 }
 0x2cd   : > { %v1525_v30 = vmax.f32 %v1510_v61, 0.0 }
 0x2cf   : > { %v1366_v1 = vpop.permute.xlu0 %1365 }
 0x2d0   : > { %v1362_v14 = vpop.permute.xlu1 %1361  ;;  %v1393_v36 = vmul.f32 %v1366_v1, %v1353_v16  ;;  %v1162_v1 = vadd.f32 %v2630_v59, %v1161_v57  ;;  %v1355_v16 = vmax.f32 %v1340_v10, 0.0 }
 0x2d1   : > { %v1392_v37 = vmul.f32 %v1362_v14, %v1352_v28  ;;  %v1164_v14 = vpop.f32.mrf.mxu3  ;;  %v994_v28 = vpop.f32.mrf.mxu2 }
 0x2d2   : > { %v1401_v42 = vadd.f32 %v1393_v36, %v1223_v38  ;;  %v1177_v15 = vmax.f32 %v1162_v1, 0.0  ;;  %v1512_v38 = vpop.f32.mrf.mxu1  ;;  %v1165_v41 = vadd.f32 %v2630_v59, %v1164_v14 }
 0x2d3   : > { %v2657_v24 = vpop.permute.xlu2 %1029  ;;  %v1400_v44 = vadd.f32 %v1392_v37, %v1222_v22 }
 0x2d4   : > { %v1055_v29 = vmul.f32 %v2657_v24, %v1007_v17  ;;  %v1178_v27 = vmax.f32 %v1165_v41, 0.0 }
 0x2d8   : > { %v1536_v40 = vpop.permute.xlu0 %1535 }
 0x2d9   : > { %v1563_v43 = vmul.f32 %v1536_v40, %v1523_v35  ;;  %v1532_v39 = vpop.permute.xlu1 %1531  ;;  %v1166_v37 = vpop.f32.mrf.mxu3  ;;  %v995_v40 = vadd.f32 %v2642_v3, %v994_v28 }
 0x2da   : > { %v1562_v45 = vmul.f32 %v1532_v39, %v1522_v13  ;;  %v996_v24 = vpop.f32.mrf.mxu2  ;;  %v1513_v39 = vadd.f32 %v2652_v8, %v1512_v38  ;;  %v1514_v25 = vpop.f32.mrf.mxu1  ;;  %v1167_v61 = vadd.f32 %v2630_v59, %v1166_v37 }
 0x2db   : > { %v1571_v48 = vadd.f32 %v1563_v43, %v1401_v42  ;;  %v1343_v42 = vadd.f32 %v2637_v63, %v1342_v32  ;;  %v1344_v43 = vpop.f32.mrf.mxu0  ;;  %v1008_v19 = vmax.f32 %v995_v40, 0.0  ;;  %v997_v32 = vadd.f32 %v2642_v3, %v996_v24 }
 0x2dc   : > { %v1570_v50 = vadd.f32 %v1562_v45, %v1400_v44  ;;  %v1200_v62 = vpop.permute.xlu2 %1199  ;;  %v1526_v4 = vmax.f32 %v1513_v39, 0.0  ;;  %v1179_v39 = vmax.f32 %v1167_v61, 0.0 }
 0x2dd   : > { %1579 = vst [vmem:[%s2663_s27 + $0x8] sm:$0xff] %v1571_v48  ;;  %v1356_v44 = vmax.f32 %v1343_v42, 0.0  ;;  %v1218_v48 = vmul.f32 %v1200_v62, %v1178_v27  ;;  %v1009_v27 = vmax.f32 %v997_v32, 0.0 }
 0x2de   : > { %1578 = vst [vmem:[%s2663_s27] sm:$0xff] %v1570_v50 }
 0x2e2   : > { %v1025_v46 = vpop.permute.xlu0 %1024 }
 0x2e3   : > { %v1054_v23 = vmul.f32 %v1025_v46, %v1006_v2  ;;  %v1196_v55 = vpop.permute.xlu1 %1195  ;;  %v1169_v2 = vpop.f32.mrf.mxu3 }
 0x2e4   : > { %v1217_v31 = vmul.f32 %v1196_v55, %v1177_v15  ;;  %v999_v46 = vpop.f32.mrf.mxu2  ;;  %v1170_v15 = vadd.f32 %v2630_v59, %v1169_v2 }
 0x2e5   : > { %v1224_v49 = vadd.f32 %v1216_v11, %v1054_v23  ;;  %v1378_v34 = vpop.permute.xlu2 %1377  ;;  %v1347_v11 = vpop.f32.mrf.mxu0  ;;  %v1000_v14 = vadd.f32 %v2642_v3, %v999_v46 }
 0x2e6   : > { %v1225_v33 = vadd.f32 %v1217_v31, %v1055_v29  ;;  %v1396_v52 = vmul.f32 %v1378_v34, %v1356_v44 }
 0x2e7   : > { %v1402_v51 = vadd.f32 %v1394_v60, %v1224_v49  ;;  %v1517_v60 = vpop.f32.mrf.mxu1 }
 0x2e8   : > { %v1518_v28 = vadd.f32 %v2652_v8, %v1517_v60 }
 0x2e9   : > { %v1572_v58 = vadd.f32 %v1564_v47, %v1402_v51 }
 0x2ea   : > { %v1528_v40 = vmax.f32 %v1518_v28, 0.0 }
 0x2eb   : > { %1580 = vst [vmem:[%s2663_s27 + $0x10] sm:$0xff] %v1572_v58  ;;  %v1171_v49 = vpop.f32.mrf.mxu3 }
 0x2ec   : > { %v1374_v12 = vpop.permute.xlu1 %1373  ;;  %v1001_v62 = vpop.f32.mrf.mxu2  ;;  %v1172_v51 = vadd.f32 %v2630_v59, %v1171_v49 }
 0x2ed   : > { %v1395_v26 = vmul.f32 %v1374_v12, %v1355_v16  ;;  %v1208_v23 = vpop.permute.xlu0 %1207  ;;  %v1349_v47 = vpop.f32.mrf.mxu0  ;;  %v1002_v56 = vadd.f32 %v2642_v3, %v1001_v62  ;;  %v1348_v16 = vadd.f32 %v2637_v63, %v1347_v11 }
 0x2ee   : > { %v1548_v18 = vpop.permute.xlu2 %1547  ;;  %v1350_v7 = vadd.f32 %v2637_v63, %v1349_v47  ;;  %v1181_v21 = vmax.f32 %v1172_v51, 0.0 }
 0x2ef   : > { %v1403_v36 = vadd.f32 %v1395_v26, %v1225_v33  ;;  %v1566_v6 = vmul.f32 %v1548_v18, %v1526_v4  ;;  %v1519_v10 = vpop.f32.mrf.mxu1  ;;  %v1011_v20 = vmax.f32 %v1002_v56, 0.0  ;;  %v1010_v26 = vmax.f32 %v1000_v14, 0.0 }
 0x2f0   : > { %v1359_v12 = vmax.f32 %v1350_v7, 0.0  ;;  %v1520_v17 = vadd.f32 %v2652_v8, %v1519_v10  ;;  %v1358_v33 = vmax.f32 %v1348_v16, 0.0 }
 0x2f5   : > { %v1544_v35 = vpop.permute.xlu1 %1543 }
 0x2f6   : > { %v1565_v13 = vmul.f32 %v1544_v35, %v1525_v30  ;;  %v1386_v58 = vpop.permute.xlu0 %1385  ;;  %v1180_v30 = vmax.f32 %v1170_v15, 0.0  ;;  %v1345_v35 = vadd.f32 %v2637_v63, %v1344_v43 }
 0x2f7   : > { %v2680_v5 = vpop.permute.xlu2 %1039  ;;  %v1398_v3 = vmul.f32 %v1386_v58, %v1358_v33 }
 0x2f8   : > { %v1573_v22 = vadd.f32 %v1565_v13, %v1403_v36  ;;  %v1529_v13 = vmax.f32 %v1520_v17, 0.0  ;;  %v1357_v44 = vmax.f32 %v1345_v35, 0.0 }
 0x2fa   : > { %1581 = vst [vmem:[%s2663_s27 + $0x18] sm:$0xff] %v1573_v22  ;;  %v1220_v22 = vmul.f32 %v1208_v23, %v1180_v30 }
 0x2fe   : > { %v1035_v45 = vpop.permute.xlu1 %1034 }
 0x2ff   : > { %v1056_v50 = vmul.f32 %v1035_v45, %v1008_v19  ;;  %v1050_v53 = vpop.permute.xlu2 %1049  ;;  %v1556_v19 = vpop.permute.xlu0 %1555  ;;  %v1515_v45 = vadd.f32 %v2652_v8, %v1514_v25 }
 0x300   : > { %v1059_v31 = vmul.f32 %v1050_v53, %v1011_v20 }
 0x301   : > { %v1226_v0 = vadd.f32 %v1218_v48, %v1056_v50  ;;  %v1568_v48 = vmul.f32 %v1556_v19, %v1528_v40  ;;  %v1057_v50 = vmul.f32 %v2680_v5, %v1009_v27 }
 0x303   : > { %v1404_v9 = vadd.f32 %v1396_v52, %v1226_v0  ;;  %v1527_v0 = vmax.f32 %v1515_v45, 0.0 }
 0x305   : > { %v1574_v54 = vadd.f32 %v1566_v6, %v1404_v9 }
 0x307   : > { %1582 = vst [vmem:[%s2663_s27 + $0x20] sm:$0xff] %v1574_v54  ;;  %v1204_v55 = vpop.permute.xlu1 %1203 }
 0x308   : > { %v1212_v57 = vpop.permute.xlu2 %1211  ;;  %v1219_v63 = vmul.f32 %v1204_v55, %v1179_v39 }
 0x309   : > { %v1221_v18 = vmul.f32 %v1212_v57, %v1181_v21 }
 0x30a   : > { %v1227_v2 = vadd.f32 %v1219_v63, %v1057_v50 }
 0x30b   : > { %v1229_v36 = vadd.f32 %v1221_v18, %v1059_v31 }
 0x310   : > { %v1382_v34 = vpop.permute.xlu1 %1381 }
 0x311   : > { %v1390_v1 = vpop.permute.xlu2 %1389  ;;  %v1397_v53 = vmul.f32 %v1382_v34, %v1357_v44 }
 0x312   : > { %v1399_v29 = vmul.f32 %v1390_v1, %v1359_v12 }
 0x313   : > { %v1405_v9 = vadd.f32 %v1397_v53, %v1227_v2 }
 0x314   : > { %v1407_v59 = vadd.f32 %v1399_v29, %v1229_v36 }
 0x319   : > { %v1045_v38 = vpop.permute.xlu1 %1044 }
 0x31a   : > { %v1058_v41 = vmul.f32 %v1045_v38, %v1010_v26  ;;  %v1560_v42 = vpop.permute.xlu2 %1559 }
 0x31b   : > { %v1569_v37 = vmul.f32 %v1560_v42, %v1529_v13 }
 0x31c   : > { %v1228_v24 = vadd.f32 %v1220_v22, %v1058_v41 }
 0x31d   : > { %v1577_v43 = vadd.f32 %v1569_v37, %v1407_v59 }
 0x31e   : > { %v1406_v4 = vadd.f32 %v1398_v3, %v1228_v24 }
 0x31f   : > { %1585 = vst [vmem:[%s2663_s27 + $0x38] sm:$0xff] %v1577_v43 }
 0x320   : > { %v1576_v52 = vadd.f32 %v1568_v48, %v1406_v4 }
 0x322   : > { %1584 = vst [vmem:[%s2663_s27 + $0x30] sm:$0xff] %v1576_v52  ;;  %v1552_v6 = vpop.permute.xlu1 %1551 }
 0x323   : > { %v1567_v46 = vmul.f32 %v1552_v6, %v1527_v0 }
 0x325   : > { %v1575_v11 = vadd.f32 %v1567_v46, %v1405_v9 }
 0x327   : > { %1583 = vst [vmem:[%s2663_s27 + $0x28] sm:$0xff] %v1575_v11 }
 0x328 PF: > { %s18_s24 = sadd.s32 1, %s2196_s24  }
 0x329   : > { %p15_p7 = scmp.ge.s32.totalorder %s18_s24, 6  }
 0x32b   :  { %17 = sbr.rel (!%p15_p7) target bundleno = 1 (0x1), region = 86 }
 0x330   :  { %1608 = vsyncpa [#allocation3], 1 }
 0x331   :  { %1610 = vsyncpa [#allocation3 + $0x1], 1 }

</bundles_post_ra>
